<compile_context>
chip_gen: v5e
topology: v5e:2x2
jax: 0.10.0
libtpu: 0.0.40
codegen_flags: <defaults>
</compile_context>

<pallas_src>
import jax
import jax.numpy as jnp
import numpy as np
from jax.experimental import pallas as pl
from jax.experimental.pallas import tpu as pltpu

KH, KW = 5, 5
PAD = 2
EPS = 1e-12  # F.normalize default eps


def _make_kernel(w: int, hw_pad: int, group_size: int, n_groups: int):
    """Kernel over refs:
       x_ref: (1, C, HW)   m_ref: (group_size, 1, HW)   o_ref: (1, group_size, C, HW)
    """

    def kernel(x_ref, m_ref, o_ref):
        # Normalization is computed once per grid step (hoisted out of the offsets).
        x = x_ref[0].astype(jnp.float32)                     # (C, HW)
        r = jnp.maximum(x, 0.0)
        sumsq = jnp.sum(r * r, axis=0, keepdims=True)        # (1, HW), XLU reduce
        # 1 / max(||r||, EPS) == rsqrt(max(sumsq, EPS^2)); rsqrt runs on the EUP.
        inv = jax.lax.rsqrt(jnp.maximum(sumsq, EPS * EPS))
        n = r * inv                                           # (C, HW)

        def emit_group(gg: int):
            # Static Python loop over the offsets of group gg -> static roll shifts.
            for j in range(group_size):
                kk = gg * group_size + j
                du = kk // KW - PAD
                dv = kk % KW - PAD
                shift = (-(du * w + dv)) % hw_pad             # static Python int
                shifted = n if shift == 0 else pltpu.roll(n, shift=shift, axis=1)
                mask = m_ref[j].astype(jnp.float32)           # (1, HW), {0, 1}
                o_ref[0, j] = (n * shifted * mask).astype(o_ref.dtype)

        if n_groups == 1:
            emit_group(0)
        else:
            g = pl.program_id(1)
            for gg in range(n_groups):
                @pl.when(g == gg)
                def _(gg=gg):
                    emit_group(gg)

    return kernel


def _build_masks(h: int, w: int, hw_pad: int):
    """(KH*KW, 1, hw_pad) float32 validity masks for the zero-padded 5x5 window."""
    rows = np.arange(h)[:, None]
    cols = np.arange(w)[None, :]
    masks = np.zeros((KH * KW, 1, hw_pad), np.float32)
    for u in range(KH):
        for v in range(KW):
            du, dv = u - PAD, v - PAD
            valid = ((rows + du >= 0) & (rows + du < h) &
                     (cols + dv >= 0) & (cols + dv < w))
            masks[u * KW + v, 0, :h * w] = valid.astype(np.float32).reshape(-1)
    return jnp.asarray(masks)


def _choose_grouping(c: int, hw_pad: int, out_itemsize: int,
                     budget_bytes: int = 24 << 20):
    """Pick offsets-per-step so the double-buffered working set stays well under the
    scoped-VMEM default on every chip generation (incl. v7x's smaller VMEM)."""
    for group_size in (KH * KW, 5, 1):
        resident = (2 * group_size * c * hw_pad * out_itemsize   # output, double-buffered
                    + 2 * c * hw_pad * 4                         # input, double-buffered
                    + 2 * group_size * hw_pad * 4                # masks
                    + 4 * c * hw_pad * 4)                        # f32 compute temporaries
        if resident <= budget_bytes:
            return group_size, (KH * KW) // group_size
    return 1, KH * KW


def self_correlation(x, torch_layout: bool = True, out_dtype=None):
    """x: (b, c, h, w) NCHW.

    Returns (b, c, h, w, KH, KW) if torch_layout (PyTorch-identical), otherwise
    the kernel's native lane-dense layout (b, KH*KW, c, h*w) (same values; avoids
    re-streaming the 25x tensor through HBM for the permute).
    out_dtype: optional narrower store dtype (e.g. jnp.bfloat16) to halve the
    dominant output-write HBM traffic; defaults to x.dtype.
    """
    b, c, h, w = x.shape
    hw = h * w
    hw_pad = ((hw + 127) // 128) * 128                 # dense 128-lane stores
    out_dtype = x.dtype if out_dtype is None else out_dtype
    group_size, n_groups = _choose_grouping(c, hw_pad, np.dtype(out_dtype).itemsize)
    # TODO(synk): for very small C (e.g. 4) stores use <8 sublanes; padding C to 8
    # would re-stream the output through HBM for the slice-back, so it is left as-is.

    masks = _build_masks(h, w, hw_pad)
    x_flat = x.reshape(b, c, hw)                       # free reshape (contiguous)
    if hw_pad != hw:
        # Zero-pad the flattened spatial axis.  Valid positions never wrap into the
        # pad (their neighbor index stays < h*w) and invalid ones are masked to 0,
        # so flattened-roll semantics are preserved.
        x_flat = jnp.pad(x_flat, ((0, 0), (0, 0), (0, hw_pad - hw)))

    out = pl.pallas_call(
        _make_kernel(w, hw_pad, group_size, n_groups),
        out_shape=jax.ShapeDtypeStruct((b, KH * KW, c, hw_pad), out_dtype),
        grid=(b, n_groups),
        in_specs=[
            pl.BlockSpec((1, c, hw_pad), lambda i, g: (i, 0, 0)),
            pl.BlockSpec((group_size, 1, hw_pad), lambda i, g: (g, 0, 0)),
        ],
        out_specs=pl.BlockSpec((1, group_size, c, hw_pad),
                               lambda i, g: (i, g, 0, 0)),
        compiler_params=pltpu.CompilerParams(
            dimension_semantics=("parallel", "parallel")),
    )(x_flat, masks)

    if hw_pad != hw:
        out = out[..., :hw]
    if not torch_layout:
        return out

    # Glue (outside the kernel): (b, kh*kw, c, h*w) -> (b, c, h, w, kh, kw).
    out = out.reshape(b, KH, KW, c, h, w)
    return jnp.transpose(out, (0, 3, 4, 5, 1, 2))


def _reference(x):
    """Pure-JAX reference mirroring the PyTorch forward."""
    b, c, h, w = x.shape
    r = jnp.maximum(x, 0.0)
    norm = jnp.sqrt(jnp.sum(r * r, axis=1, keepdims=True))
    n = r / jnp.maximum(norm, EPS)
    padded = jnp.pad(n, ((0, 0), (0, 0), (PAD, PAD), (PAD, PAD)))
    out = jnp.zeros((b, c, h, w, KH, KW), x.dtype)
    for u in range(KH):
        for v in range(KW):
            out = out.at[..., u, v].set(n * padded[:, :, u:u + h, v:v + w])
    return out


if __name__ == "__main__":
    key = jax.random.PRNGKey(0)
    x = jax.random.normal(key, (2, 4, 16, 16), dtype=jnp.float32)

    y = self_correlation(x)
    jax.block_until_ready(y)

    y_ref = _reference(x)
    assert y.shape == (2, 4, 16, 16, KH, KW), y.shape
    assert jnp.allclose(y, y_ref, atol=1e-5, rtol=1e-5), \
        float(jnp.max(jnp.abs(y - y_ref)))

    print("KERNEL_OK")
</pallas_src>

<mosaic_0001>
module attributes {stable_mosaic.version = 11 : i64} {
  func.func @kernel(%arg0: i32, %arg1: i32, %arg2: memref<1x4x256xf32, #tpu.memory_space<vmem>>, %arg3: memref<25x1x256xf32, #tpu.memory_space<vmem>>, %arg4: memref<1x25x4x256xf32, #tpu.memory_space<vmem>>) attributes {dimension_semantics = [#tpu.dimension_semantics<parallel>, #tpu.dimension_semantics<parallel>], iteration_bounds = array<i64: 2, 1>, scalar_prefetch = 0 : i64, scratch_operands = 0 : i64, tpu.core_type = #tpu.core_type<tc>, window_params = [{transform_indices = @transform_0, window_bounds = array<i64: 1, 4, 256>}, {transform_indices = @transform_1, window_bounds = array<i64: 25, 1, 256>}, {transform_indices = @transform_2, window_bounds = array<i64: 1, 25, 4, 256>}]} {
    %c0 = arith.constant 0 : index
    %c0_0 = arith.constant 0 : index
    %c0_1 = arith.constant 0 : index
    %0 = vector.load %arg2[%c0, %c0_0, %c0_1] : memref<1x4x256xf32, #tpu.memory_space<vmem>>, vector<1x4x256xf32>
    %1 = vector.shape_cast %0 : vector<1x4x256xf32> to vector<4x256xf32>
    %cst = arith.constant 0.000000e+00 : f32
    %2 = vector.broadcast %cst : f32 to vector<4x256xf32>
    %3 = arith.maximumf %1, %2 : vector<4x256xf32>
    %4 = arith.mulf %3, %3 : vector<4x256xf32>
    %cst_2 = arith.constant dense<0.000000e+00> : vector<256xf32>
    %5 = vector.multi_reduction <add>, %4, %cst_2 [0] : vector<4x256xf32> to vector<256xf32>
    %6 = vector.shape_cast %5 : vector<256xf32> to vector<1x256xf32>
    %cst_3 = arith.constant 1.000000e-24 : f32
    %7 = vector.broadcast %cst_3 : f32 to vector<1x256xf32>
    %8 = arith.maximumf %6, %7 : vector<1x256xf32>
    %9 = math.rsqrt %8 : vector<1x256xf32>
    %10 = vector.broadcast %9 : vector<1x256xf32> to vector<4x256xf32>
    %11 = arith.mulf %3, %10 : vector<4x256xf32>
    %c34_i32 = arith.constant 34 : i32
    %12 = tpu.dynamic_rotate %11 by %c34_i32 dim 1 : vector<4x256xf32>, i32 -> vector<4x256xf32>
    %c0_4 = arith.constant 0 : index
    %c0_5 = arith.constant 0 : index
    %c0_6 = arith.constant 0 : index
    %13 = vector.load %arg3[%c0_4, %c0_5, %c0_6] : memref<25x1x256xf32, #tpu.memory_space<vmem>>, vector<1x1x256xf32>
    %14 = vector.shape_cast %13 : vector<1x1x256xf32> to vector<1x256xf32>
    %15 = arith.mulf %11, %12 : vector<4x256xf32>
    %16 = vector.broadcast %14 : vector<1x256xf32> to vector<4x256xf32>
    %17 = arith.mulf %15, %16 : vector<4x256xf32>
    %c0_7 = arith.constant 0 : index
    %c0_8 = arith.constant 0 : index
    %c0_9 = arith.constant 0 : index
    %c0_10 = arith.constant 0 : index
    %18 = vector.load %arg4[%c0_7, %c0_8, %c0_9, %c0_10] : memref<1x25x4x256xf32, #tpu.memory_space<vmem>>, vector<1x1x4x256xf32>
    %19 = vector.shape_cast %18 : vector<1x1x4x256xf32> to vector<4x256xf32>
    %20 = vector.shape_cast %17 : vector<4x256xf32> to vector<1x1x4x256xf32>
    tpu.vector_store %arg4[%c0_7, %c0_8, %c0_9, %c0_10], %20 {strides = array<i32>} : memref<1x25x4x256xf32, #tpu.memory_space<vmem>>, vector<1x1x4x256xf32>,
    %c33_i32 = arith.constant 33 : i32
    %21 = tpu.dynamic_rotate %11 by %c33_i32 dim 1 : vector<4x256xf32>, i32 -> vector<4x256xf32>
    %c1 = arith.constant 1 : index
    %c0_11 = arith.constant 0 : index
    %c0_12 = arith.constant 0 : index
    %22 = vector.load %arg3[%c1, %c0_11, %c0_12] : memref<25x1x256xf32, #tpu.memory_space<vmem>>, vector<1x1x256xf32>
    %23 = vector.shape_cast %22 : vector<1x1x256xf32> to vector<1x256xf32>
    %24 = arith.mulf %11, %21 : vector<4x256xf32>
    %25 = vector.broadcast %23 : vector<1x256xf32> to vector<4x256xf32>
    %26 = arith.mulf %24, %25 : vector<4x256xf32>
    %c0_13 = arith.constant 0 : index
    %c1_14 = arith.constant 1 : index
    %c0_15 = arith.constant 0 : index
    %c0_16 = arith.constant 0 : index
    %27 = vector.load %arg4[%c0_13, %c1_14, %c0_15, %c0_16] : memref<1x25x4x256xf32, #tpu.memory_space<vmem>>, vector<1x1x4x256xf32>
    %28 = vector.shape_cast %27 : vector<1x1x4x256xf32> to vector<4x256xf32>
    %29 = vector.shape_cast %26 : vector<4x256xf32> to vector<1x1x4x256xf32>
    tpu.vector_store %arg4[%c0_13, %c1_14, %c0_15, %c0_16], %29 {strides = array<i32>} : memref<1x25x4x256xf32, #tpu.memory_space<vmem>>, vector<1x1x4x256xf32>,
    %c32_i32 = arith.constant 32 : i32
    %30 = tpu.dynamic_rotate %11 by %c32_i32 dim 1 : vector<4x256xf32>, i32 -> vector<4x256xf32>
    %c2 = arith.constant 2 : index
    %c0_17 = arith.constant 0 : index
    %c0_18 = arith.constant 0 : index
    %31 = vector.load %arg3[%c2, %c0_17, %c0_18] : memref<25x1x256xf32, #tpu.memory_space<vmem>>, vector<1x1x256xf32>
    %32 = vector.shape_cast %31 : vector<1x1x256xf32> to vector<1x256xf32>
    %33 = arith.mulf %11, %30 : vector<4x256xf32>
    %34 = vector.broadcast %32 : vector<1x256xf32> to vector<4x256xf32>
    %35 = arith.mulf %33, %34 : vector<4x256xf32>
    %c0_19 = arith.constant 0 : index
    %c2_20 = arith.constant 2 : index
    %c0_21 = arith.constant 0 : index
    %c0_22 = arith.constant 0 : index
    %36 = vector.load %arg4[%c0_19, %c2_20, %c0_21, %c0_22] : memref<1x25x4x256xf32, #tpu.memory_space<vmem>>, vector<1x1x4x256xf32>
    %37 = vector.shape_cast %36 : vector<1x1x4x256xf32> to vector<4x256xf32>
    %38 = vector.shape_cast %35 : vector<4x256xf32> to vector<1x1x4x256xf32>
    tpu.vector_store %arg4[%c0_19, %c2_20, %c0_21, %c0_22], %38 {strides = array<i32>} : memref<1x25x4x256xf32, #tpu.memory_space<vmem>>, vector<1x1x4x256xf32>,
    %c31_i32 = arith.constant 31 : i32
    %39 = tpu.dynamic_rotate %11 by %c31_i32 dim 1 : vector<4x256xf32>, i32 -> vector<4x256xf32>
    %c3 = arith.constant 3 : index
    %c0_23 = arith.constant 0 : index
    %c0_24 = arith.constant 0 : index
    %40 = vector.load %arg3[%c3, %c0_23, %c0_24] : memref<25x1x256xf32, #tpu.memory_space<vmem>>, vector<1x1x256xf32>
    %41 = vector.shape_cast %40 : vector<1x1x256xf32> to vector<1x256xf32>
    %42 = arith.mulf %11, %39 : vector<4x256xf32>
    %43 = vector.broadcast %41 : vector<1x256xf32> to vector<4x256xf32>
    %44 = arith.mulf %42, %43 : vector<4x256xf32>
    %c0_25 = arith.constant 0 : index
    %c3_26 = arith.constant 3 : index
    %c0_27 = arith.constant 0 : index
    %c0_28 = arith.constant 0 : index
    %45 = vector.load %arg4[%c0_25, %c3_26, %c0_27, %c0_28] : memref<1x25x4x256xf32, #tpu.memory_space<vmem>>, vector<1x1x4x256xf32>
    %46 = vector.shape_cast %45 : vector<1x1x4x256xf32> to vector<4x256xf32>
    %47 = vector.shape_cast %44 : vector<4x256xf32> to vector<1x1x4x256xf32>
    tpu.vector_store %arg4[%c0_25, %c3_26, %c0_27, %c0_28], %47 {strides = array<i32>} : memref<1x25x4x256xf32, #tpu.memory_space<vmem>>, vector<1x1x4x256xf32>,
    %c30_i32 = arith.constant 30 : i32
    %48 = tpu.dynamic_rotate %11 by %c30_i32 dim 1 : vector<4x256xf32>, i32 -> vector<4x256xf32>
    %c4 = arith.constant 4 : index
    %c0_29 = arith.constant 0 : index
    %c0_30 = arith.constant 0 : index
    %49 = vector.load %arg3[%c4, %c0_29, %c0_30] : memref<25x1x256xf32, #tpu.memory_space<vmem>>, vector<1x1x256xf32>
    %50 = vector.shape_cast %49 : vector<1x1x256xf32> to vector<1x256xf32>
    %51 = arith.mulf %11, %48 : vector<4x256xf32>
    %52 = vector.broadcast %50 : vector<1x256xf32> to vector<4x256xf32>
    %53 = arith.mulf %51, %52 : vector<4x256xf32>
    %c0_31 = arith.constant 0 : index
    %c4_32 = arith.constant 4 : index
    %c0_33 = arith.constant 0 : index
    %c0_34 = arith.constant 0 : index
    %54 = vector.load %arg4[%c0_31, %c4_32, %c0_33, %c0_34] : memref<1x25x4x256xf32, #tpu.memory_space<vmem>>, vector<1x1x4x256xf32>
    %55 = vector.shape_cast %54 : vector<1x1x4x256xf32> to vector<4x256xf32>
    %56 = vector.shape_cast %53 : vector<4x256xf32> to vector<1x1x4x256xf32>
    tpu.vector_store %arg4[%c0_31, %c4_32, %c0_33, %c0_34], %56 {strides = array<i32>} : memref<1x25x4x256xf32, #tpu.memory_space<vmem>>, vector<1x1x4x256xf32>,
    %c18_i32 = arith.constant 18 : i32
    %57 = tpu.dynamic_rotate %11 by %c18_i32 dim 1 : vector<4x256xf32>, i32 -> vector<4x256xf32>
    %c5 = arith.constant 5 : index
    %c0_35 = arith.constant 0 : index
    %c0_36 = arith.constant 0 : index
    %58 = vector.load %arg3[%c5, %c0_35, %c0_36] : memref<25x1x256xf32, #tpu.memory_space<vmem>>, vector<1x1x256xf32>
    %59 = vector.shape_cast %58 : vector<1x1x256xf32> to vector<1x256xf32>
    %60 = arith.mulf %11, %57 : vector<4x256xf32>
    %61 = vector.broadcast %59 : vector<1x256xf32> to vector<4x256xf32>
    %62 = arith.mulf %60, %61 : vector<4x256xf32>
    %c0_37 = arith.constant 0 : index
    %c5_38 = arith.constant 5 : index
    %c0_39 = arith.constant 0 : index
    %c0_40 = arith.constant 0 : index
    %63 = vector.load %arg4[%c0_37, %c5_38, %c0_39, %c0_40] : memref<1x25x4x256xf32, #tpu.memory_space<vmem>>, vector<1x1x4x256xf32>
    %64 = vector.shape_cast %63 : vector<1x1x4x256xf32> to vector<4x256xf32>
    %65 = vector.shape_cast %62 : vector<4x256xf32> to vector<1x1x4x256xf32>
    tpu.vector_store %arg4[%c0_37, %c5_38, %c0_39, %c0_40], %65 {strides = array<i32>} : memref<1x25x4x256xf32, #tpu.memory_space<vmem>>, vector<1x1x4x256xf32>,
    %c17_i32 = arith.constant 17 : i32
    %66 = tpu.dynamic_rotate %11 by %c17_i32 dim 1 : vector<4x256xf32>, i32 -> vector<4x256xf32>
    %c6 = arith.constant 6 : index
    %c0_41 = arith.constant 0 : index
    %c0_42 = arith.constant 0 : index
    %67 = vector.load %arg3[%c6, %c0_41, %c0_42] : memref<25x1x256xf32, #tpu.memory_space<vmem>>, vector<1x1x256xf32>
    %68 = vector.shape_cast %67 : vector<1x1x256xf32> to vector<1x256xf32>
    %69 = arith.mulf %11, %66 : vector<4x256xf32>
    %70 = vector.broadcast %68 : vector<1x256xf32> to vector<4x256xf32>
    %71 = arith.mulf %69, %70 : vector<4x256xf32>
    %c0_43 = arith.constant 0 : index
    %c6_44 = arith.constant 6 : index
    %c0_45 = arith.constant 0 : index
    %c0_46 = arith.constant 0 : index
    %72 = vector.load %arg4[%c0_43, %c6_44, %c0_45, %c0_46] : memref<1x25x4x256xf32, #tpu.memory_space<vmem>>, vector<1x1x4x256xf32>
    %73 = vector.shape_cast %72 : vector<1x1x4x256xf32> to vector<4x256xf32>
    %74 = vector.shape_cast %71 : vector<4x256xf32> to vector<1x1x4x256xf32>
    tpu.vector_store %arg4[%c0_43, %c6_44, %c0_45, %c0_46], %74 {strides = array<i32>} : memref<1x25x4x256xf32, #tpu.memory_space<vmem>>, vector<1x1x4x256xf32>,
    %c16_i32 = arith.constant 16 : i32
    %75 = tpu.dynamic_rotate %11 by %c16_i32 dim 1 : vector<4x256xf32>, i32 -> vector<4x256xf32>
    %c7 = arith.constant 7 : index
    %c0_47 = arith.constant 0 : index
    %c0_48 = arith.constant 0 : index
    %76 = vector.load %arg3[%c7, %c0_47, %c0_48] : memref<25x1x256xf32, #tpu.memory_space<vmem>>, vector<1x1x256xf32>
    %77 = vector.shape_cast %76 : vector<1x1x256xf32> to vector<1x256xf32>
    %78 = arith.mulf %11, %75 : vector<4x256xf32>
    %79 = vector.broadcast %77 : vector<1x256xf32> to vector<4x256xf32>
    %80 = arith.mulf %78, %79 : vector<4x256xf32>
    %c0_49 = arith.constant 0 : index
    %c7_50 = arith.constant 7 : index
    %c0_51 = arith.constant 0 : index
    %c0_52 = arith.constant 0 : index
    %81 = vector.load %arg4[%c0_49, %c7_50, %c0_51, %c0_52] : memref<1x25x4x256xf32, #tpu.memory_space<vmem>>, vector<1x1x4x256xf32>
    %82 = vector.shape_cast %81 : vector<1x1x4x256xf32> to vector<4x256xf32>
    %83 = vector.shape_cast %80 : vector<4x256xf32> to vector<1x1x4x256xf32>
    tpu.vector_store %arg4[%c0_49, %c7_50, %c0_51, %c0_52], %83 {strides = array<i32>} : memref<1x25x4x256xf32, #tpu.memory_space<vmem>>, vector<1x1x4x256xf32>,
    %c15_i32 = arith.constant 15 : i32
    %84 = tpu.dynamic_rotate %11 by %c15_i32 dim 1 : vector<4x256xf32>, i32 -> vector<4x256xf32>
    %c8 = arith.constant 8 : index
    %c0_53 = arith.constant 0 : index
    %c0_54 = arith.constant 0 : index
    %85 = vector.load %arg3[%c8, %c0_53, %c0_54] : memref<25x1x256xf32, #tpu.memory_space<vmem>>, vector<1x1x256xf32>
    %86 = vector.shape_cast %85 : vector<1x1x256xf32> to vector<1x256xf32>
    %87 = arith.mulf %11, %84 : vector<4x256xf32>
    %88 = vector.broadcast %86 : vector<1x256xf32> to vector<4x256xf32>
    %89 = arith.mulf %87, %88 : vector<4x256xf32>
    %c0_55 = arith.constant 0 : index
    %c8_56 = arith.constant 8 : index
    %c0_57 = arith.constant 0 : index
    %c0_58 = arith.constant 0 : index
    %90 = vector.load %arg4[%c0_55, %c8_56, %c0_57, %c0_58] : memref<1x25x4x256xf32, #tpu.memory_space<vmem>>, vector<1x1x4x256xf32>
    %91 = vector.shape_cast %90 : vector<1x1x4x256xf32> to vector<4x256xf32>
    %92 = vector.shape_cast %89 : vector<4x256xf32> to vector<1x1x4x256xf32>
    tpu.vector_store %arg4[%c0_55, %c8_56, %c0_57, %c0_58], %92 {strides = array<i32>} : memref<1x25x4x256xf32, #tpu.memory_space<vmem>>, vector<1x1x4x256xf32>,
    %c14_i32 = arith.constant 14 : i32
    %93 = tpu.dynamic_rotate %11 by %c14_i32 dim 1 : vector<4x256xf32>, i32 -> vector<4x256xf32>
    %c9 = arith.constant 9 : index
    %c0_59 = arith.constant 0 : index
    %c0_60 = arith.constant 0 : index
    %94 = vector.load %arg3[%c9, %c0_59, %c0_60] : memref<25x1x256xf32, #tpu.memory_space<vmem>>, vector<1x1x256xf32>
    %95 = vector.shape_cast %94 : vector<1x1x256xf32> to vector<1x256xf32>
    %96 = arith.mulf %11, %93 : vector<4x256xf32>
    %97 = vector.broadcast %95 : vector<1x256xf32> to vector<4x256xf32>
    %98 = arith.mulf %96, %97 : vector<4x256xf32>
    %c0_61 = arith.constant 0 : index
    %c9_62 = arith.constant 9 : index
    %c0_63 = arith.constant 0 : index
    %c0_64 = arith.constant 0 : index
    %99 = vector.load %arg4[%c0_61, %c9_62, %c0_63, %c0_64] : memref<1x25x4x256xf32, #tpu.memory_space<vmem>>, vector<1x1x4x256xf32>
    %100 = vector.shape_cast %99 : vector<1x1x4x256xf32> to vector<4x256xf32>
    %101 = vector.shape_cast %98 : vector<4x256xf32> to vector<1x1x4x256xf32>
    tpu.vector_store %arg4[%c0_61, %c9_62, %c0_63, %c0_64], %101 {strides = array<i32>} : memref<1x25x4x256xf32, #tpu.memory_space<vmem>>, vector<1x1x4x256xf32>,
    %c2_i32 = arith.constant 2 : i32
    %102 = tpu.dynamic_rotate %11 by %c2_i32 dim 1 : vector<4x256xf32>, i32 -> vector<4x256xf32>
    %c10 = arith.constant 10 : index
    %c0_65 = arith.constant 0 : index
    %c0_66 = arith.constant 0 : index
    %103 = vector.load %arg3[%c10, %c0_65, %c0_66] : memref<25x1x256xf32, #tpu.memory_space<vmem>>, vector<1x1x256xf32>
    %104 = vector.shape_cast %103 : vector<1x1x256xf32> to vector<1x256xf32>
    %105 = arith.mulf %11, %102 : vector<4x256xf32>
    %106 = vector.broadcast %104 : vector<1x256xf32> to vector<4x256xf32>
    %107 = arith.mulf %105, %106 : vector<4x256xf32>
    %c0_67 = arith.constant 0 : index
    %c10_68 = arith.constant 10 : index
    %c0_69 = arith.constant 0 : index
    %c0_70 = arith.constant 0 : index
    %108 = vector.load %arg4[%c0_67, %c10_68, %c0_69, %c0_70] : memref<1x25x4x256xf32, #tpu.memory_space<vmem>>, vector<1x1x4x256xf32>
    %109 = vector.shape_cast %108 : vector<1x1x4x256xf32> to vector<4x256xf32>
    %110 = vector.shape_cast %107 : vector<4x256xf32> to vector<1x1x4x256xf32>
    tpu.vector_store %arg4[%c0_67, %c10_68, %c0_69, %c0_70], %110 {strides = array<i32>} : memref<1x25x4x256xf32, #tpu.memory_space<vmem>>, vector<1x1x4x256xf32>,
    %c1_i32 = arith.constant 1 : i32
    %111 = tpu.dynamic_rotate %11 by %c1_i32 dim 1 : vector<4x256xf32>, i32 -> vector<4x256xf32>
    %c11 = arith.constant 11 : index
    %c0_71 = arith.constant 0 : index
    %c0_72 = arith.constant 0 : index
    %112 = vector.load %arg3[%c11, %c0_71, %c0_72] : memref<25x1x256xf32, #tpu.memory_space<vmem>>, vector<1x1x256xf32>
    %113 = vector.shape_cast %112 : vector<1x1x256xf32> to vector<1x256xf32>
    %114 = arith.mulf %11, %111 : vector<4x256xf32>
    %115 = vector.broadcast %113 : vector<1x256xf32> to vector<4x256xf32>
    %116 = arith.mulf %114, %115 : vector<4x256xf32>
    %c0_73 = arith.constant 0 : index
    %c11_74 = arith.constant 11 : index
    %c0_75 = arith.constant 0 : index
    %c0_76 = arith.constant 0 : index
    %117 = vector.load %arg4[%c0_73, %c11_74, %c0_75, %c0_76] : memref<1x25x4x256xf32, #tpu.memory_space<vmem>>, vector<1x1x4x256xf32>
    %118 = vector.shape_cast %117 : vector<1x1x4x256xf32> to vector<4x256xf32>
    %119 = vector.shape_cast %116 : vector<4x256xf32> to vector<1x1x4x256xf32>
    tpu.vector_store %arg4[%c0_73, %c11_74, %c0_75, %c0_76], %119 {strides = array<i32>} : memref<1x25x4x256xf32, #tpu.memory_space<vmem>>, vector<1x1x4x256xf32>,
    %c12 = arith.constant 12 : index
    %c0_77 = arith.constant 0 : index
    %c0_78 = arith.constant 0 : index
    %120 = vector.load %arg3[%c12, %c0_77, %c0_78] : memref<25x1x256xf32, #tpu.memory_space<vmem>>, vector<1x1x256xf32>
    %121 = vector.shape_cast %120 : vector<1x1x256xf32> to vector<1x256xf32>
    %122 = arith.mulf %11, %11 : vector<4x256xf32>
    %123 = vector.broadcast %121 : vector<1x256xf32> to vector<4x256xf32>
    %124 = arith.mulf %122, %123 : vector<4x256xf32>
    %c0_79 = arith.constant 0 : index
    %c12_80 = arith.constant 12 : index
    %c0_81 = arith.constant 0 : index
    %c0_82 = arith.constant 0 : index
    %125 = vector.load %arg4[%c0_79, %c12_80, %c0_81, %c0_82] : memref<1x25x4x256xf32, #tpu.memory_space<vmem>>, vector<1x1x4x256xf32>
    %126 = vector.shape_cast %125 : vector<1x1x4x256xf32> to vector<4x256xf32>
    %127 = vector.shape_cast %124 : vector<4x256xf32> to vector<1x1x4x256xf32>
    tpu.vector_store %arg4[%c0_79, %c12_80, %c0_81, %c0_82], %127 {strides = array<i32>} : memref<1x25x4x256xf32, #tpu.memory_space<vmem>>, vector<1x1x4x256xf32>,
    %c255_i32 = arith.constant 255 : i32
    %128 = tpu.dynamic_rotate %11 by %c255_i32 dim 1 : vector<4x256xf32>, i32 -> vector<4x256xf32>
    %c13 = arith.constant 13 : index
    %c0_83 = arith.constant 0 : index
    %c0_84 = arith.constant 0 : index
    %129 = vector.load %arg3[%c13, %c0_83, %c0_84] : memref<25x1x256xf32, #tpu.memory_space<vmem>>, vector<1x1x256xf32>
    %130 = vector.shape_cast %129 : vector<1x1x256xf32> to vector<1x256xf32>
    %131 = arith.mulf %11, %128 : vector<4x256xf32>
    %132 = vector.broadcast %130 : vector<1x256xf32> to vector<4x256xf32>
    %133 = arith.mulf %131, %132 : vector<4x256xf32>
    %c0_85 = arith.constant 0 : index
    %c13_86 = arith.constant 13 : index
    %c0_87 = arith.constant 0 : index
    %c0_88 = arith.constant 0 : index
    %134 = vector.load %arg4[%c0_85, %c13_86, %c0_87, %c0_88] : memref<1x25x4x256xf32, #tpu.memory_space<vmem>>, vector<1x1x4x256xf32>
    %135 = vector.shape_cast %134 : vector<1x1x4x256xf32> to vector<4x256xf32>
    %136 = vector.shape_cast %133 : vector<4x256xf32> to vector<1x1x4x256xf32>
    tpu.vector_store %arg4[%c0_85, %c13_86, %c0_87, %c0_88], %136 {strides = array<i32>} : memref<1x25x4x256xf32, #tpu.memory_space<vmem>>, vector<1x1x4x256xf32>,
    %c254_i32 = arith.constant 254 : i32
    %137 = tpu.dynamic_rotate %11 by %c254_i32 dim 1 : vector<4x256xf32>, i32 -> vector<4x256xf32>
    %c14 = arith.constant 14 : index
    %c0_89 = arith.constant 0 : index
    %c0_90 = arith.constant 0 : index
    %138 = vector.load %arg3[%c14, %c0_89, %c0_90] : memref<25x1x256xf32, #tpu.memory_space<vmem>>, vector<1x1x256xf32>
    %139 = vector.shape_cast %138 : vector<1x1x256xf32> to vector<1x256xf32>
    %140 = arith.mulf %11, %137 : vector<4x256xf32>
    %141 = vector.broadcast %139 : vector<1x256xf32> to vector<4x256xf32>
    %142 = arith.mulf %140, %141 : vector<4x256xf32>
    %c0_91 = arith.constant 0 : index
    %c14_92 = arith.constant 14 : index
    %c0_93 = arith.constant 0 : index
    %c0_94 = arith.constant 0 : index
    %143 = vector.load %arg4[%c0_91, %c14_92, %c0_93, %c0_94] : memref<1x25x4x256xf32, #tpu.memory_space<vmem>>, vector<1x1x4x256xf32>
    %144 = vector.shape_cast %143 : vector<1x1x4x256xf32> to vector<4x256xf32>
    %145 = vector.shape_cast %142 : vector<4x256xf32> to vector<1x1x4x256xf32>
    tpu.vector_store %arg4[%c0_91, %c14_92, %c0_93, %c0_94], %145 {strides = array<i32>} : memref<1x25x4x256xf32, #tpu.memory_space<vmem>>, vector<1x1x4x256xf32>,
    %c242_i32 = arith.constant 242 : i32
    %146 = tpu.dynamic_rotate %11 by %c242_i32 dim 1 : vector<4x256xf32>, i32 -> vector<4x256xf32>
    %c15 = arith.constant 15 : index
    %c0_95 = arith.constant 0 : index
    %c0_96 = arith.constant 0 : index
    %147 = vector.load %arg3[%c15, %c0_95, %c0_96] : memref<25x1x256xf32, #tpu.memory_space<vmem>>, vector<1x1x256xf32>
    %148 = vector.shape_cast %147 : vector<1x1x256xf32> to vector<1x256xf32>
    %149 = arith.mulf %11, %146 : vector<4x256xf32>
    %150 = vector.broadcast %148 : vector<1x256xf32> to vector<4x256xf32>
    %151 = arith.mulf %149, %150 : vector<4x256xf32>
    %c0_97 = arith.constant 0 : index
    %c15_98 = arith.constant 15 : index
    %c0_99 = arith.constant 0 : index
    %c0_100 = arith.constant 0 : index
    %152 = vector.load %arg4[%c0_97, %c15_98, %c0_99, %c0_100] : memref<1x25x4x256xf32, #tpu.memory_space<vmem>>, vector<1x1x4x256xf32>
    %153 = vector.shape_cast %152 : vector<1x1x4x256xf32> to vector<4x256xf32>
    %154 = vector.shape_cast %151 : vector<4x256xf32> to vector<1x1x4x256xf32>
    tpu.vector_store %arg4[%c0_97, %c15_98, %c0_99, %c0_100], %154 {strides = array<i32>} : memref<1x25x4x256xf32, #tpu.memory_space<vmem>>, vector<1x1x4x256xf32>,
    %c241_i32 = arith.constant 241 : i32
    %155 = tpu.dynamic_rotate %11 by %c241_i32 dim 1 : vector<4x256xf32>, i32 -> vector<4x256xf32>
    %c16 = arith.constant 16 : index
    %c0_101 = arith.constant 0 : index
    %c0_102 = arith.constant 0 : index
    %156 = vector.load %arg3[%c16, %c0_101, %c0_102] : memref<25x1x256xf32, #tpu.memory_space<vmem>>, vector<1x1x256xf32>
    %157 = vector.shape_cast %156 : vector<1x1x256xf32> to vector<1x256xf32>
    %158 = arith.mulf %11, %155 : vector<4x256xf32>
    %159 = vector.broadcast %157 : vector<1x256xf32> to vector<4x256xf32>
    %160 = arith.mulf %158, %159 : vector<4x256xf32>
    %c0_103 = arith.constant 0 : index
    %c16_104 = arith.constant 16 : index
    %c0_105 = arith.constant 0 : index
    %c0_106 = arith.constant 0 : index
    %161 = vector.load %arg4[%c0_103, %c16_104, %c0_105, %c0_106] : memref<1x25x4x256xf32, #tpu.memory_space<vmem>>, vector<1x1x4x256xf32>
    %162 = vector.shape_cast %161 : vector<1x1x4x256xf32> to vector<4x256xf32>
    %163 = vector.shape_cast %160 : vector<4x256xf32> to vector<1x1x4x256xf32>
    tpu.vector_store %arg4[%c0_103, %c16_104, %c0_105, %c0_106], %163 {strides = array<i32>} : memref<1x25x4x256xf32, #tpu.memory_space<vmem>>, vector<1x1x4x256xf32>,
    %c240_i32 = arith.constant 240 : i32
    %164 = tpu.dynamic_rotate %11 by %c240_i32 dim 1 : vector<4x256xf32>, i32 -> vector<4x256xf32>
    %c17 = arith.constant 17 : index
    %c0_107 = arith.constant 0 : index
    %c0_108 = arith.constant 0 : index
    %165 = vector.load %arg3[%c17, %c0_107, %c0_108] : memref<25x1x256xf32, #tpu.memory_space<vmem>>, vector<1x1x256xf32>
    %166 = vector.shape_cast %165 : vector<1x1x256xf32> to vector<1x256xf32>
    %167 = arith.mulf %11, %164 : vector<4x256xf32>
    %168 = vector.broadcast %166 : vector<1x256xf32> to vector<4x256xf32>
    %169 = arith.mulf %167, %168 : vector<4x256xf32>
    %c0_109 = arith.constant 0 : index
    %c17_110 = arith.constant 17 : index
    %c0_111 = arith.constant 0 : index
    %c0_112 = arith.constant 0 : index
    %170 = vector.load %arg4[%c0_109, %c17_110, %c0_111, %c0_112] : memref<1x25x4x256xf32, #tpu.memory_space<vmem>>, vector<1x1x4x256xf32>
    %171 = vector.shape_cast %170 : vector<1x1x4x256xf32> to vector<4x256xf32>
    %172 = vector.shape_cast %169 : vector<4x256xf32> to vector<1x1x4x256xf32>
    tpu.vector_store %arg4[%c0_109, %c17_110, %c0_111, %c0_112], %172 {strides = array<i32>} : memref<1x25x4x256xf32, #tpu.memory_space<vmem>>, vector<1x1x4x256xf32>,
    %c239_i32 = arith.constant 239 : i32
    %173 = tpu.dynamic_rotate %11 by %c239_i32 dim 1 : vector<4x256xf32>, i32 -> vector<4x256xf32>
    %c18 = arith.constant 18 : index
    %c0_113 = arith.constant 0 : index
    %c0_114 = arith.constant 0 : index
    %174 = vector.load %arg3[%c18, %c0_113, %c0_114] : memref<25x1x256xf32, #tpu.memory_space<vmem>>, vector<1x1x256xf32>
    %175 = vector.shape_cast %174 : vector<1x1x256xf32> to vector<1x256xf32>
    %176 = arith.mulf %11, %173 : vector<4x256xf32>
    %177 = vector.broadcast %175 : vector<1x256xf32> to vector<4x256xf32>
    %178 = arith.mulf %176, %177 : vector<4x256xf32>
    %c0_115 = arith.constant 0 : index
    %c18_116 = arith.constant 18 : index
    %c0_117 = arith.constant 0 : index
    %c0_118 = arith.constant 0 : index
    %179 = vector.load %arg4[%c0_115, %c18_116, %c0_117, %c0_118] : memref<1x25x4x256xf32, #tpu.memory_space<vmem>>, vector<1x1x4x256xf32>
    %180 = vector.shape_cast %179 : vector<1x1x4x256xf32> to vector<4x256xf32>
    %181 = vector.shape_cast %178 : vector<4x256xf32> to vector<1x1x4x256xf32>
    tpu.vector_store %arg4[%c0_115, %c18_116, %c0_117, %c0_118], %181 {strides = array<i32>} : memref<1x25x4x256xf32, #tpu.memory_space<vmem>>, vector<1x1x4x256xf32>,
    %c238_i32 = arith.constant 238 : i32
    %182 = tpu.dynamic_rotate %11 by %c238_i32 dim 1 : vector<4x256xf32>, i32 -> vector<4x256xf32>
    %c19 = arith.constant 19 : index
    %c0_119 = arith.constant 0 : index
    %c0_120 = arith.constant 0 : index
    %183 = vector.load %arg3[%c19, %c0_119, %c0_120] : memref<25x1x256xf32, #tpu.memory_space<vmem>>, vector<1x1x256xf32>
    %184 = vector.shape_cast %183 : vector<1x1x256xf32> to vector<1x256xf32>
    %185 = arith.mulf %11, %182 : vector<4x256xf32>
    %186 = vector.broadcast %184 : vector<1x256xf32> to vector<4x256xf32>
    %187 = arith.mulf %185, %186 : vector<4x256xf32>
    %c0_121 = arith.constant 0 : index
    %c19_122 = arith.constant 19 : index
    %c0_123 = arith.constant 0 : index
    %c0_124 = arith.constant 0 : index
    %188 = vector.load %arg4[%c0_121, %c19_122, %c0_123, %c0_124] : memref<1x25x4x256xf32, #tpu.memory_space<vmem>>, vector<1x1x4x256xf32>
    %189 = vector.shape_cast %188 : vector<1x1x4x256xf32> to vector<4x256xf32>
    %190 = vector.shape_cast %187 : vector<4x256xf32> to vector<1x1x4x256xf32>
    tpu.vector_store %arg4[%c0_121, %c19_122, %c0_123, %c0_124], %190 {strides = array<i32>} : memref<1x25x4x256xf32, #tpu.memory_space<vmem>>, vector<1x1x4x256xf32>,
    %c226_i32 = arith.constant 226 : i32
    %191 = tpu.dynamic_rotate %11 by %c226_i32 dim 1 : vector<4x256xf32>, i32 -> vector<4x256xf32>
    %c20 = arith.constant 20 : index
    %c0_125 = arith.constant 0 : index
    %c0_126 = arith.constant 0 : index
    %192 = vector.load %arg3[%c20, %c0_125, %c0_126] : memref<25x1x256xf32, #tpu.memory_space<vmem>>, vector<1x1x256xf32>
    %193 = vector.shape_cast %192 : vector<1x1x256xf32> to vector<1x256xf32>
    %194 = arith.mulf %11, %191 : vector<4x256xf32>
    %195 = vector.broadcast %193 : vector<1x256xf32> to vector<4x256xf32>
    %196 = arith.mulf %194, %195 : vector<4x256xf32>
    %c0_127 = arith.constant 0 : index
    %c20_128 = arith.constant 20 : index
    %c0_129 = arith.constant 0 : index
    %c0_130 = arith.constant 0 : index
    %197 = vector.load %arg4[%c0_127, %c20_128, %c0_129, %c0_130] : memref<1x25x4x256xf32, #tpu.memory_space<vmem>>, vector<1x1x4x256xf32>
    %198 = vector.shape_cast %197 : vector<1x1x4x256xf32> to vector<4x256xf32>
    %199 = vector.shape_cast %196 : vector<4x256xf32> to vector<1x1x4x256xf32>
    tpu.vector_store %arg4[%c0_127, %c20_128, %c0_129, %c0_130], %199 {strides = array<i32>} : memref<1x25x4x256xf32, #tpu.memory_space<vmem>>, vector<1x1x4x256xf32>,
    %c225_i32 = arith.constant 225 : i32
    %200 = tpu.dynamic_rotate %11 by %c225_i32 dim 1 : vector<4x256xf32>, i32 -> vector<4x256xf32>
    %c21 = arith.constant 21 : index
    %c0_131 = arith.constant 0 : index
    %c0_132 = arith.constant 0 : index
    %201 = vector.load %arg3[%c21, %c0_131, %c0_132] : memref<25x1x256xf32, #tpu.memory_space<vmem>>, vector<1x1x256xf32>
    %202 = vector.shape_cast %201 : vector<1x1x256xf32> to vector<1x256xf32>
    %203 = arith.mulf %11, %200 : vector<4x256xf32>
    %204 = vector.broadcast %202 : vector<1x256xf32> to vector<4x256xf32>
    %205 = arith.mulf %203, %204 : vector<4x256xf32>
    %c0_133 = arith.constant 0 : index
    %c21_134 = arith.constant 21 : index
    %c0_135 = arith.constant 0 : index
    %c0_136 = arith.constant 0 : index
    %206 = vector.load %arg4[%c0_133, %c21_134, %c0_135, %c0_136] : memref<1x25x4x256xf32, #tpu.memory_space<vmem>>, vector<1x1x4x256xf32>
    %207 = vector.shape_cast %206 : vector<1x1x4x256xf32> to vector<4x256xf32>
    %208 = vector.shape_cast %205 : vector<4x256xf32> to vector<1x1x4x256xf32>
    tpu.vector_store %arg4[%c0_133, %c21_134, %c0_135, %c0_136], %208 {strides = array<i32>} : memref<1x25x4x256xf32, #tpu.memory_space<vmem>>, vector<1x1x4x256xf32>,
    %c224_i32 = arith.constant 224 : i32
    %209 = tpu.dynamic_rotate %11 by %c224_i32 dim 1 : vector<4x256xf32>, i32 -> vector<4x256xf32>
    %c22 = arith.constant 22 : index
    %c0_137 = arith.constant 0 : index
    %c0_138 = arith.constant 0 : index
    %210 = vector.load %arg3[%c22, %c0_137, %c0_138] : memref<25x1x256xf32, #tpu.memory_space<vmem>>, vector<1x1x256xf32>
    %211 = vector.shape_cast %210 : vector<1x1x256xf32> to vector<1x256xf32>
    %212 = arith.mulf %11, %209 : vector<4x256xf32>
    %213 = vector.broadcast %211 : vector<1x256xf32> to vector<4x256xf32>
    %214 = arith.mulf %212, %213 : vector<4x256xf32>
    %c0_139 = arith.constant 0 : index
    %c22_140 = arith.constant 22 : index
    %c0_141 = arith.constant 0 : index
    %c0_142 = arith.constant 0 : index
    %215 = vector.load %arg4[%c0_139, %c22_140, %c0_141, %c0_142] : memref<1x25x4x256xf32, #tpu.memory_space<vmem>>, vector<1x1x4x256xf32>
    %216 = vector.shape_cast %215 : vector<1x1x4x256xf32> to vector<4x256xf32>
    %217 = vector.shape_cast %214 : vector<4x256xf32> to vector<1x1x4x256xf32>
    tpu.vector_store %arg4[%c0_139, %c22_140, %c0_141, %c0_142], %217 {strides = array<i32>} : memref<1x25x4x256xf32, #tpu.memory_space<vmem>>, vector<1x1x4x256xf32>,
    %c223_i32 = arith.constant 223 : i32
    %218 = tpu.dynamic_rotate %11 by %c223_i32 dim 1 : vector<4x256xf32>, i32 -> vector<4x256xf32>
    %c23 = arith.constant 23 : index
    %c0_143 = arith.constant 0 : index
    %c0_144 = arith.constant 0 : index
    %219 = vector.load %arg3[%c23, %c0_143, %c0_144] : memref<25x1x256xf32, #tpu.memory_space<vmem>>, vector<1x1x256xf32>
    %220 = vector.shape_cast %219 : vector<1x1x256xf32> to vector<1x256xf32>
    %221 = arith.mulf %11, %218 : vector<4x256xf32>
    %222 = vector.broadcast %220 : vector<1x256xf32> to vector<4x256xf32>
    %223 = arith.mulf %221, %222 : vector<4x256xf32>
    %c0_145 = arith.constant 0 : index
    %c23_146 = arith.constant 23 : index
    %c0_147 = arith.constant 0 : index
    %c0_148 = arith.constant 0 : index
    %224 = vector.load %arg4[%c0_145, %c23_146, %c0_147, %c0_148] : memref<1x25x4x256xf32, #tpu.memory_space<vmem>>, vector<1x1x4x256xf32>
    %225 = vector.shape_cast %224 : vector<1x1x4x256xf32> to vector<4x256xf32>
    %226 = vector.shape_cast %223 : vector<4x256xf32> to vector<1x1x4x256xf32>
    tpu.vector_store %arg4[%c0_145, %c23_146, %c0_147, %c0_148], %226 {strides = array<i32>} : memref<1x25x4x256xf32, #tpu.memory_space<vmem>>, vector<1x1x4x256xf32>,
    %c222_i32 = arith.constant 222 : i32
    %227 = tpu.dynamic_rotate %11 by %c222_i32 dim 1 : vector<4x256xf32>, i32 -> vector<4x256xf32>
    %c24 = arith.constant 24 : index
    %c0_149 = arith.constant 0 : index
    %c0_150 = arith.constant 0 : index
    %228 = vector.load %arg3[%c24, %c0_149, %c0_150] : memref<25x1x256xf32, #tpu.memory_space<vmem>>, vector<1x1x256xf32>
    %229 = vector.shape_cast %228 : vector<1x1x256xf32> to vector<1x256xf32>
    %230 = arith.mulf %11, %227 : vector<4x256xf32>
    %231 = vector.broadcast %229 : vector<1x256xf32> to vector<4x256xf32>
    %232 = arith.mulf %230, %231 : vector<4x256xf32>
    %c0_151 = arith.constant 0 : index
    %c24_152 = arith.constant 24 : index
    %c0_153 = arith.constant 0 : index
    %c0_154 = arith.constant 0 : index
    %233 = vector.load %arg4[%c0_151, %c24_152, %c0_153, %c0_154] : memref<1x25x4x256xf32, #tpu.memory_space<vmem>>, vector<1x1x4x256xf32>
    %234 = vector.shape_cast %233 : vector<1x1x4x256xf32> to vector<4x256xf32>
    %235 = vector.shape_cast %232 : vector<4x256xf32> to vector<1x1x4x256xf32>
    tpu.vector_store %arg4[%c0_151, %c24_152, %c0_153, %c0_154], %235 {strides = array<i32>} : memref<1x25x4x256xf32, #tpu.memory_space<vmem>>, vector<1x1x4x256xf32>,
    return
  }
  func.func @transform_0(%arg0: i32, %arg1: i32) -> (i32, i32, i32) {
    %c0_i32 = arith.constant 0 : i32
    %c0_i32_0 = arith.constant 0 : i32
    %c0_i32_1 = arith.constant 0 : i32
    return %arg0, %c0_i32, %c0_i32_0 : i32, i32, i32
  }
  func.func @transform_1(%arg0: i32, %arg1: i32) -> (i32, i32, i32) {
    %c0_i32 = arith.constant 0 : i32
    %c0_i32_0 = arith.constant 0 : i32
    %c0_i32_1 = arith.constant 0 : i32
    return %arg1, %c0_i32, %c0_i32_0 : i32, i32, i32
  }
  func.func @transform_2(%arg0: i32, %arg1: i32) -> (i32, i32, i32, i32) {
    %c0_i32 = arith.constant 0 : i32
    %c0_i32_0 = arith.constant 0 : i32
    %c0_i32_1 = arith.constant 0 : i32
    return %arg0, %arg1, %c0_i32, %c0_i32_0 : i32, i32, i32, i32
  }
}

</mosaic_0001>

<bundles_post_ra>
// kernel: tpu_custom_call.1
= control target key start
LH: loop header
LB: loop body
LE: loop exit
PB: predicated region body
PF: predicated region fallthrough
CT: control target
= control target key end

     0   :  { %7 = vsyncpa [#allocation3], 0  ;;  %s1723_s0 = inlined_call_operand.hbm [shape: f32[2,4,256], index: 0, kind: input, shape index: {}]   ;;  %s1724_s1 = inlined_call_operand.hbm [shape: f32[25,1,256], index: 1, kind: input, shape index: {}]   ;;  %s1725_s2 = inlined_call_operand.hbm [shape: f32[2,25,4,256], index: 2, kind: output, shape index: {}]  }
   0x1   :  { %9 = vsyncpa [#allocation3 + $0x1], 0 }
   0x2   :  { %10 = vsyncpa [#allocation6], 0 }
   0x3   :  { %11 = vsyncpa [#allocation4], 0 }
   0x4   :  { %13 = vsyncpa [#allocation4 + $0x1], 0  ;;  %s1417_s9 = smov 0   ;;  %s1419_s10 = smov 0  }
   0x5   :  { %s1421_s11 = smov 0   ;;  %s1423_s12 = smov 0  }
   0x6   :  { %s1425_s13 = smov 0   ;;  %s1427_s14 = smov 0  }
   0x7 LB: > { %s1079_s15 = sadd.s32 4294967295, %s1371_s14   ;;  %p1081_p0 = scmp.ge.s32.totalorder %s1371_s14, 1  ;;  %s1371_s14 = sphi %s1427_s14, %s19_s14   ;;  %s1367_s13 = sphi %s1425_s13, %s1736_s13   ;;  %s1363_s12 = sphi %s1423_s12, %s1735_s12   ;;  %s1359_s11 = sphi %s1421_s11, %s1734_s11   ;;  %s1355_s10 = sphi %s1419_s10, %s1733_s10   ;;  %s1351_s9 = sphi %s1417_s9, %s1732_s9  }
   0x8   : > { %p1449_p1 = scmp.eq.s32.totalorder %s1079_s15, 0  ;;  %p116_p2 = scmp.lt.s32.totalorder %s1371_s14, 3 }
   0x9   : > { %s130_s19 = sshll.u32 %s1724_s1, 4  ;;  %s1373_s21 = smov [#allocation5]   ;;  %s131_s19 = int_to_ptr.hbm [resolvable:$true] %s130_s19 }
   0xa   : > { %p1457_p3 = pnand %p1081_p0, %p116_p2  ;;  %s132_s22 = sshll.u32 %s1373_s21, 4  ;;  %s133_s22 = int_to_ptr.vmem [resolvable:$true] %s132_s22 }
   0xb   : > { %p1083_p6 = scmp.ge.s32.totalorder %s1371_s14, 2  ;;  %s1374_s23 = smov 32  }
   0xc   : > { %p1128_p4 = pneg %p1457_p3  ;;  %s1375_s24 = smov 2  }
   0xd   : > { %s1080_s25 = sadd.s32 4294967294, %s1371_s14   ;;  %s31_s26 = sadd.s32 1, %s1367_s13 }
   0xe   : > { %p1129_p5 = pnand %p1128_p4, %p1449_p1  ;;  %s38_s27 = sadd.s32 1, %s1359_s11 }
   0xf   : > { %p33_p7 = scmp.ge.s32.totalorder %s31_s26, 2  ;;  %p45_p8 = scmp.ne.s32.totalorder %s1359_s11, %s1355_s10 }
  0x10   : > { %1131 = dma.hbm_to_vmem [thread:$0]  (!%p1129_p5), %s131_s19, 800, %s133_s22, [#allocation6], %s1374_s23, %s1374_s23, %s1375_s24  }
  0x11   : > { %p46_p9 = scmp.eq.s32.totalorder %s1371_s14, 0  ;;  %p51_p10 = scmp.ne.s32.totalorder %s1355_s10, %s1351_s9 }
  0x12   : > { %s1738_s26 = smov (%p33_p7, %s31_s26), 0  ;;  %p103_p13 = scmp.eq.s32.totalorder %s1079_s15, 1 }
  0x13   : > { %p1476_p11 = por %p46_p9, %p45_p8  ;;  %p1482_p12 = por %p1449_p1, %p51_p10 }
  0x14   : > { %s35_s30 = ssub.s32 %s1367_s13, %s1738_s26  ;;  %p109_p2 = scmp.eq.s32.totalorder %s1080_s25, 1 }
  0x15   : > { %p36_p0 = scmp.eq.s32.totalorder %s35_s30, 0  ;;  %p1488_p4 = por %p103_p13, %p45_p8 }
  0x16   : > { %p1141_p5 = scmp.lt.s32.totalorder %s1371_s14, 2  ;;  %p1496_p7 = por %p109_p2, %p51_p10 }
  0x17   : > { %s1494_s4 = scalar_select %p36_p0, %s1359_s11, %s38_s27  }
  0x18   : > { %s146_s6 = sand.u32 1, %s1359_s11   ;;  %s1117_s8 = sshll.u32 %s1367_s13, 3 }
  0x19   : > { %s1084_s7 = sshll.u32 %s146_s6, 3  ;;  %s155_s15 = scalar_lea.hbm %s1723_s0, %s1117_s8 }
  0x1a   : > { %s150_s19 = scalar_lea.vmem [#allocation2], %s1084_s7  ;;  %s157_s22 = sshll.u32 %s155_s15, 4  ;;  %s158_s22 = int_to_ptr.hbm [resolvable:$true] %s157_s22 }
  0x1b   : > { %s159_s21 = sshll.u32 %s150_s19, 4  ;;  %p1133_p8 = pnand %p1141_p5, %p1476_p11  ;;  %s160_s21 = int_to_ptr.vmem [resolvable:$true] %s159_s21 }
  0x1c   : > { %s147_s23 = scalar_lea.sflag [#allocation3], %s146_s6  ;;  %168 = sbr.rel (%p1457_p3) target bundleno = 407 (0x197), region = 28 }
  0x1d   : > { %1135 = dma.hbm_to_vmem [thread:$0]  (!%p1133_p8), %s158_s22, 128, %s160_s21, %s147_s23  }
  0x1e   : > { %s1510_s24 = sand.u32 (!%p1457_p3), 1, %s1355_s10  }
  0x1f   : > { %s1088_s25 = sshll.u32 (!%p1457_p3), %s1510_s24, 3  ;;  %s171_s27 = scalar_lea.sflag (!%p1457_p3), [#allocation3], %s1510_s24 }
  0x20   : > { %s174_s30 = scalar_lea.vmem (!%p1457_p3), [#allocation2], %s1088_s25 }
  0x21   : > { %1338 = dma.done.wait (%p1482_p12), %s171_s27, 128  }
  0x22   : > { %1340 = vsyncadd (%p1482_p12), %s171_s27, 4294967168 }
  0x23   : > { %1342 = dma.done.wait (%p1449_p1), [#allocation6], 800  }
  0x24   : > { %1344 = vsyncadd (%p1449_p1), [#allocation6], 4294966496  ;;  %v203_v0 = vld [vmem:[%s174_s30] sm:$0xff]  ;;  %vm212_vm0 = vcmask 1043456   ;;  %s1376_s16 = smov 34   ;;  %s1377_s20 = smov 33  }
  0x25   : > { %v204_v1 = vmax.f32 %v203_v0, 0.0  ;;  %s1378_s28 = smov 32   ;;  %s1379_s29 = smov 31  }
  0x26   : > { %s1380_s6 = smov 30   ;;  %s1381_s7 = smov 18  }
  0x27   : > { %v205_v2 = vmul.f32 %v204_v1, %v204_v1  ;;  %s1382_s8 = smov 17   ;;  %s1383_s17 = smov 16  }
  0x28   : > { %s1384_s18 = smov 15   ;;  %s1385_s15 = smov 14  }
  0x29   : > { %207 = vst [vmem:[#allocation1] ss:$2 sm:$0xff] %v205_v2  ;;  %s1386_s19 = smov 2   ;;  %s1387_s21 = smov 1  }
  0x2a   : > { %s1388_s22 = smov 127   ;;  %s1389_s23 = smov 126  }
  0x2b   : > { %s1390_s25 = smov 114   ;;  %s1391_s27 = smov 113  }
  0x2c   : > { %s1392_s30 = smov 112  }
  0x30   : > { %v208_v3 = vld.sshfl [vmem:[#allocation1] sm:$0xff pattern:$0x75316420]  ;;  %v209_v4 = vld.sshfl [vmem:[#allocation1 + $0x8] sm:$0xff pattern:$0x75316420] }
  0x31   : > { %v213_v5 = vsel %vm212_vm0, %v208_v3, 0.0  ;;  %v220_v6 = vsel %vm212_vm0, %v209_v4, 0.0 }
  0x32   : > { %v214_v7 = vrot.slane %v213_v5, 4  ;;  %v221_v8 = vrot.slane %v220_v6, 4 }
  0x34   : > { %v215_v9 = vadd.f32 %v214_v7, %v213_v5  ;;  %v222_v10 = vadd.f32 %v221_v8, %v220_v6 }
  0x36   : > { %v216_v11 = vrot.slane %v215_v9, 2  ;;  %v223_v12 = vrot.slane %v222_v10, 2 }
  0x38   : > { %v217_v13 = vadd.f32 %v216_v11, %v215_v9  ;;  %v224_v14 = vadd.f32 %v223_v12, %v222_v10 }
  0x3a   : > { %v218_v15 = vrot.slane %v217_v13, 1  ;;  %v225_v16 = vrot.slane %v224_v14, 1 }
  0x3c   : > { %v219_v17 = vadd.f32 %v218_v15, %v217_v13  ;;  %v226_v18 = vadd.f32 %v225_v16, %v224_v14  ;;  %v265_v13 = vlaneseq  ;;  %v270_v14 = vld [vmem:[#allocation5] sm:$0x3]  ;;  %v298_v16 = vld [vmem:[#allocation5 + $0x2] sm:$0x3] }
  0x3e   : > { %v227_v19 = vmax.f32 %v219_v17, 1e-24  ;;  %v228_v20 = vmax.f32 %v226_v18, 1e-24  ;;  %v279_v17 = vperm.slane %v270_v14, 1 }
  0x3f   : > { %v327_v18 = vld [vmem:[#allocation5 + $0x4] sm:$0x3] }
  0x40   : > { %1221 = vrsqrt.f32 %v227_v19  ;;  %vm235_vm1 = vweird.f32 %v227_v19  ;;  %vm245_vm3 = vweird.f32 %v228_v20 }
  0x41   : > { %1223 = vrsqrt.f32 %v228_v20 }
  0x46   : > { %v1222_v21 = vpop.eup %1221 }
  0x47   : > { %v1224_v22 = vpop.eup %1223  ;;  %v230_v23 = vmul.f32 %v1222_v21, %v227_v19  ;;  %vm236_vm2 = vweird.f32 %v1222_v21  ;;  %v1546_v19 = vand.u32 127, %v265_v13 }
  0x48   : > { %v240_v24 = vmul.f32 %v1224_v22, %v228_v20  ;;  %vm246_vm4 = vweird.f32 %v1224_v22  ;;  %vm237_vm5 = vmor %vm235_vm1, %vm236_vm2  ;;  %v307_v20 = vperm.slane %v298_v16, 1 }
  0x49   : > { %v231_v25 = vmul.f32 %v1222_v21, %v230_v23  ;;  %vm247_vm6 = vmor %vm245_vm3, %vm246_vm4  ;;  %vm267_vm7 = vcmp.lt.s32.totalorder %v1546_v19, 34  ;;  %vm294_vm8 = vcmp.lt.s32.totalorder %v1546_v19, 33  ;;  %vm323_vm9 = vcmp.lt.s32.totalorder %v1546_v19, 32 }
  0x4a   : > { %v241_v26 = vmul.f32 %v1224_v22, %v240_v24  ;;  %v280_v24 = vrot.slane %v279_v17, 4  ;;  %vm352_vm10 = vcmp.lt.s32.totalorder %v1546_v19, 31  ;;  %vm381_vm11 = vcmp.lt.s32.totalorder %v1546_v19, 30 }
  0x4b   : > { %v232_v27 = vmul.f32 0.5, %v231_v25  ;;  %vm410_vm12 = vcmp.lt.s32.totalorder %v1546_v19, 18  ;;  %vm439_vm13 = vcmp.lt.s32.totalorder %v1546_v19, 17  ;;  %vm468_vm14 = vcmp.lt.s32.totalorder %v1546_v19, 16 }
  0x4c   : > { %v242_v28 = vmul.f32 0.5, %v241_v26  ;;  %vm497_vm15 = vcmp.lt.s32.totalorder %v1546_v19, 15  ;;  %vm526_vm1 = vcmp.lt.s32.totalorder %v1546_v19, 14  ;;  %vm555_vm2 = vcmp.lt.s32.totalorder %v1546_v19, 2 }
  0x4d   : > { %v233_v29 = vsub.f32 1.5, %v232_v27  ;;  %vm584_vm3 = vcmp.lt.s32.totalorder %v1546_v19, 1  ;;  %vm625_vm4 = vcmp.lt.s32.totalorder %v1546_v19, 127 }
  0x4e   : > { %v243_v30 = vsub.f32 1.5, %v242_v28  ;;  %v306_v28 = vperm.slane %v298_v16, 0 }
  0x4f   : > { %v234_v31 = vmul.f32 %v1222_v21, %v233_v29  ;;  %v335_v29 = vperm.slane %v327_v18, 0 }
  0x50   : > { %v244_v32 = vmul.f32 %v1224_v22, %v243_v30 }
  0x51   : > { %v238_v33 = vsel %vm237_vm5, %v1222_v21, %v234_v31  ;;  %v336_v21 = vperm.slane %v327_v18, 1  ;;  %v308_v31 = vrot.slane %v307_v20, 4  ;;  %vm654_vm5 = vcmp.lt.s32.totalorder %v1546_v19, 126 }
  0x52   : > { %v248_v34 = vsel %vm247_vm6, %v1224_v22, %v244_v32  ;;  %v278_v22 = vperm.slane %v270_v14, 0  ;;  %vm683_vm6 = vcmp.lt.s32.totalorder %v1546_v19, 114 }
  0x53   : > { %v251_v35 = vrot.slane %v248_v34, 4 }
  0x55   : > { %v252_v36 = vsel %vm212_vm0, %v238_v33, %v251_v35  ;;  %v337_v33 = vrot.slane %v336_v21, 4 }
  0x56   : > { %v1525_v37 = vmul.f32 %v252_v36, %v204_v1 }
  0x58   : > { %256 = vst [vmem:[#allocation1] ss:$2 sm:$0xff] %v1525_v37 }
  0x5f   : > { %v257_v38 = vld.sshfl [vmem:[#allocation1] sm:$0xff pattern:$0x75316420]  ;;  %v258_v39 = vld.sshfl [vmem:[#allocation1 + $0x8] sm:$0xff pattern:$0x75316420] }
  0x60   : > { %261 = vrot.lane.b32.xlu0 %v257_v38, %s1376_s16  ;;  %285 = vst [vmem:[#allocation1] ss:$2 sm:$0xff] %v1525_v37 }
  0x67   : > { %v286_v40 = vld.sshfl [vmem:[#allocation1] sm:$0xff pattern:$0x75316420]  ;;  %v287_v41 = vld.sshfl [vmem:[#allocation1 + $0x8] sm:$0xff pattern:$0x75316420] }
  0x68   : > { %290 = vrot.lane.b32.xlu1 %v286_v40, %s1377_s20  ;;  %263 = vrot.lane.b32.xlu0 %v258_v39, %s1376_s16  ;;  %314 = vst [vmem:[#allocation1] ss:$2 sm:$0xff] %v1525_v37  ;;  %s1393_s16 = smov 111   ;;  %v281_v40 = vsel %vm212_vm0, %v278_v22, %v280_v24 }
  0x6f   : > { %v315_v42 = vld.sshfl [vmem:[#allocation1] sm:$0xff pattern:$0x75316420]  ;;  %v316_v43 = vld.sshfl [vmem:[#allocation1 + $0x8] sm:$0xff pattern:$0x75316420] }
  0x70   : > { %292 = vrot.lane.b32.xlu1 %v287_v41, %s1377_s20  ;;  %343 = vst [vmem:[#allocation1] ss:$2 sm:$0xff] %v1525_v37  ;;  %319 = vrot.lane.b32.xlu2 %v315_v42, %s1378_s28  ;;  %s1118_s20 = smul.u32 200, %s1510_s24 }
  0x77   : > { %v344_v44 = vld.sshfl [vmem:[#allocation1] sm:$0xff pattern:$0x75316420]  ;;  %v345_v45 = vld.sshfl [vmem:[#allocation1 + $0x8] sm:$0xff pattern:$0x75316420] }
  0x78   : > { %348 = vrot.lane.b32.xlu0 %v344_v44, %s1379_s29  ;;  %350 = vrot.lane.b32.xlu1 %v345_v45, %s1379_s29  ;;  %372 = vst [vmem:[#allocation1] ss:$2 sm:$0xff] %v1525_v37  ;;  %s1562_s29 = scalar_lea.vmem [#allocation7], %s1118_s20 }
  0x79   : > { %321 = vrot.lane.b32.xlu2 %v316_v43, %s1378_s28  ;;  %s1394_s28 = smov 110  }
  0x7f   : > { %v374_v46 = vld.sshfl [vmem:[#allocation1 + $0x8] sm:$0xff pattern:$0x75316420]  ;;  %v373_v47 = vld.sshfl [vmem:[#allocation1] sm:$0xff pattern:$0x75316420] }
  0x80   : > { %379 = vrot.lane.b32.xlu0 %v374_v46, %s1380_s6  ;;  %401 = vst [vmem:[#allocation1] ss:$2 sm:$0xff] %v1525_v37  ;;  %v309_v46 = vsel %vm212_vm0, %v306_v28, %v308_v31 }
  0x81   : > { %377 = vrot.lane.b32.xlu2 %v373_v47, %s1380_s6  ;;  %s1395_s6 = smov 98  }
  0x87   : > { %v402_v48 = vld.sshfl [vmem:[#allocation1] sm:$0xff pattern:$0x75316420]  ;;  %v403_v49 = vld.sshfl [vmem:[#allocation1 + $0x8] sm:$0xff pattern:$0x75316420] }
  0x88   : > { %406 = vrot.lane.b32.xlu1 %v402_v48, %s1381_s7  ;;  %430 = vst [vmem:[#allocation1] ss:$2 sm:$0xff] %v1525_v37 }
  0x89   : > { %408 = vrot.lane.b32.xlu2 %v403_v49, %s1381_s7  ;;  %s1396_s7 = smov 97  }
  0x8f   : > { %v431_v50 = vld.sshfl [vmem:[#allocation1] sm:$0xff pattern:$0x75316420]  ;;  %v432_v51 = vld.sshfl [vmem:[#allocation1 + $0x8] sm:$0xff pattern:$0x75316420] }
  0x90   : > { %435 = vrot.lane.b32.xlu0 %v431_v50, %s1382_s8  ;;  %437 = vrot.lane.b32.xlu1 %v432_v51, %s1382_s8  ;;  %459 = vst [vmem:[#allocation1] ss:$2 sm:$0xff] %v1525_v37  ;;  %v338_v51 = vsel %vm212_vm0, %v335_v29, %v337_v33  ;;  %s1397_s8 = smov 96  }
  0x97   : > { %v461_v52 = vld.sshfl [vmem:[#allocation1 + $0x8] sm:$0xff pattern:$0x75316420]  ;;  %v460_v53 = vld.sshfl [vmem:[#allocation1] sm:$0xff pattern:$0x75316420] }
  0x98   : > { %466 = vrot.lane.b32.xlu0 %v461_v52, %s1383_s17  ;;  %488 = vst [vmem:[#allocation1] ss:$2 sm:$0xff] %v1525_v37  ;;  %464 = vrot.lane.b32.xlu2 %v460_v53, %s1383_s17  ;;  %s1398_s17 = smov 95  }
  0x9f   : > { %v489_v54 = vld.sshfl [vmem:[#allocation1] sm:$0xff pattern:$0x75316420]  ;;  %v490_v55 = vld.sshfl [vmem:[#allocation1 + $0x8] sm:$0xff pattern:$0x75316420] }
  0xa0   : > { %493 = vrot.lane.b32.xlu1 %v489_v54, %s1384_s18  ;;  %517 = vst [vmem:[#allocation1] ss:$2 sm:$0xff] %v1525_v37  ;;  %495 = vrot.lane.b32.xlu2 %v490_v55, %s1384_s18  ;;  %s1399_s18 = smov 94  }
  0xa7   : > { %v518_v56 = vld.sshfl [vmem:[#allocation1] sm:$0xff pattern:$0x75316420]  ;;  %v519_v57 = vld.sshfl [vmem:[#allocation1 + $0x8] sm:$0xff pattern:$0x75316420] }
  0xa8   : > { %522 = vrot.lane.b32.xlu0 %v518_v56, %s1385_s15  ;;  %524 = vrot.lane.b32.xlu1 %v519_v57, %s1385_s15  ;;  %546 = vst [vmem:[#allocation1] ss:$2 sm:$0xff] %v1525_v37  ;;  %v356_v57 = vld [vmem:[#allocation5 + $0x6] sm:$0x3]  ;;  %s1119_s15 = smul.u32 200, %s1363_s12 }
  0xaf   : > { %v547_v58 = vld.sshfl [vmem:[#allocation1] sm:$0xff pattern:$0x75316420]  ;;  %v548_v59 = vld.sshfl [vmem:[#allocation1 + $0x8] sm:$0xff pattern:$0x75316420] }
  0xb0   : > { %553 = vrot.lane.b32.xlu0 %v548_v59, %s1386_s19  ;;  %575 = vst [vmem:[#allocation1] ss:$2 sm:$0xff] %v1525_v37  ;;  %551 = vrot.lane.b32.xlu2 %v547_v58, %s1386_s19 }
  0xb7   : > { %v577_v60 = vld.sshfl [vmem:[#allocation1 + $0x8] sm:$0xff pattern:$0x75316420]  ;;  %v576_v61 = vld.sshfl [vmem:[#allocation1] sm:$0xff pattern:$0x75316420] }
  0xb8   : > { %580 = vrot.lane.b32.xlu1 %v576_v61, %s1387_s21  ;;  %616 = vst [vmem:[#allocation1] ss:$2 sm:$0xff] %v1525_v37  ;;  %582 = vrot.lane.b32.xlu2 %v577_v60, %s1387_s21  ;;  %v364_v60 = vperm.slane %v356_v57, 0  ;;  %v365_v61 = vperm.slane %v356_v57, 1 }
  0xbf   : > { %v617_v62 = vld.sshfl [vmem:[#allocation1] sm:$0xff pattern:$0x75316420]  ;;  %v618_v63 = vld.sshfl [vmem:[#allocation1 + $0x8] sm:$0xff pattern:$0x75316420] }
  0xc0   : > { %621 = vrot.lane.b32.xlu0 %v617_v62, %s1388_s22  ;;  %623 = vrot.lane.b32.xlu1 %v618_v63, %s1388_s22  ;;  %645 = vst [vmem:[#allocation1] ss:$2 sm:$0xff] %v1525_v37  ;;  %s979_s22 = scalar_lea.hbm %s1725_s2, %s1119_s15 }
  0xc1   : > { %s982_s12 = sshll.u32 %s979_s22, 4  ;;  %s983_s12 = int_to_ptr.hbm [resolvable:$true] %s982_s12 }
  0xc7   : > { %v647_v0 = vld.sshfl [vmem:[#allocation1 + $0x8] sm:$0xff pattern:$0x75316420]  ;;  %v646_v1 = vld.sshfl [vmem:[#allocation1] sm:$0xff pattern:$0x75316420] }
  0xc8   : > { %652 = vrot.lane.b32.xlu0 %v647_v0, %s1389_s23  ;;  %674 = vst [vmem:[#allocation1] ss:$2 sm:$0xff] %v1525_v37  ;;  %650 = vrot.lane.b32.xlu2 %v646_v1, %s1389_s23  ;;  %v385_v0 = vld [vmem:[#allocation5 + $0x8] sm:$0x3]  ;;  %s980_s23 = sshll.u32 %s1562_s29, 4  ;;  %s981_s23 = int_to_ptr.vmem [resolvable:$true] %s980_s23 }
  0xca   : > { %v320_v10 = vpop.permute.xlu2 %319 }
  0xcf   : > { %v675_v2 = vld.sshfl [vmem:[#allocation1] sm:$0xff pattern:$0x75316420]  ;;  %v676_v3 = vld.sshfl [vmem:[#allocation1 + $0x8] sm:$0xff pattern:$0x75316420] }
  0xd0   : > { %679 = vrot.lane.b32.xlu1 %v675_v2, %s1390_s25  ;;  %703 = vst [vmem:[#allocation1] ss:$2 sm:$0xff] %v1525_v37  ;;  %681 = vrot.lane.b32.xlu2 %v676_v3, %s1390_s25  ;;  %v393_v3 = vperm.slane %v385_v0, 0  ;;  %s965_s25 = scalar_lea.sflag [#allocation4], %s1510_s24 }
  0xd2   : > { %v262_v8 = vpop.permute.xlu0 %261 }
  0xd3   : > { %v322_v25 = vpop.permute.xlu2 %321 }
  0xd4   : > { %v324_v38 = vsel %vm323_vm9, %v320_v10, %v322_v25  ;;  %v325_v39 = vsel %vm323_vm9, %v322_v25, %v320_v10  ;;  %vm770_vm9 = vcmp.lt.s32.totalorder %v1546_v19, 111 }
  0xd5   : > { %v330_v43 = vrot.slane %v324_v38, 4 }
  0xd7   : > { %v704_v4 = vld.sshfl [vmem:[#allocation1] sm:$0xff pattern:$0x75316420]  ;;  %v705_v5 = vld.sshfl [vmem:[#allocation1 + $0x8] sm:$0xff pattern:$0x75316420]  ;;  %v331_v48 = vsel %vm212_vm0, %v325_v39, %v330_v43 }
  0xd8   : > { %708 = vrot.lane.b32.xlu0 %v704_v4, %s1391_s27  ;;  %710 = vrot.lane.b32.xlu1 %v705_v5, %s1391_s27  ;;  %732 = vst [vmem:[#allocation1] ss:$2 sm:$0xff] %v1525_v37  ;;  %v333_v52 = vmul.f32 %v331_v48, %v1525_v37  ;;  %v394_v4 = vperm.slane %v385_v0, 1  ;;  %s1299_s27 = sshra.s32 %s983_s12, 4  ;;  %s1300_s27 = int_to_ptr.hbm [resolvable:$true] %s1299_s27 }
  0xd9   : > { %p1306_p10 = scmp.lt.s32.totalorder %s1300_s27, %s1725_s2 }
  0xda   : > { %v291_v9 = vpop.permute.xlu1 %290  ;;  %v264_v15 = vpop.permute.xlu0 %263  ;;  %v340_v54 = vmul.f32 %v338_v51, %v333_v52 }
  0xdb   : > { %v268_v26 = vsel %vm267_vm7, %v262_v8, %v264_v15  ;;  %v269_v27 = vsel %vm267_vm7, %v264_v15, %v262_v8  ;;  %v378_v1 = vpop.permute.xlu2 %377  ;;  %vm712_vm7 = vcmp.lt.s32.totalorder %v1546_v19, 113 }
  0xdc   : > { %v273_v30 = vrot.slane %v268_v26, 4  ;;  %1091 = vst [vmem:[%s1562_s29 + $0x10] sm:$0xff] %v340_v54  ;;  %v501_v54 = vld [vmem:[#allocation5 + $0x10] sm:$0x3] }
  0xde   : > { %v274_v41 = vsel %vm212_vm0, %v269_v27, %v273_v30  ;;  %v443_v27 = vld [vmem:[#allocation5 + $0xc] sm:$0x3] }
  0xdf   : > { %v734_v6 = vld.sshfl [vmem:[#allocation1 + $0x8] sm:$0xff pattern:$0x75316420]  ;;  %v733_v7 = vld.sshfl [vmem:[#allocation1] sm:$0xff pattern:$0x75316420]  ;;  %v276_v45 = vmul.f32 %v274_v41, %v1525_v37 }
  0xe0   : > { %739 = vrot.lane.b32.xlu0 %v734_v6, %s1392_s30  ;;  %761 = vst [vmem:[#allocation1] ss:$2 sm:$0xff] %v1525_v37  ;;  %737 = vrot.lane.b32.xlu2 %v733_v7, %s1392_s30  ;;  %v414_v6 = vld [vmem:[#allocation5 + $0xa] sm:$0x3]  ;;  %v366_v7 = vrot.slane %v365_v61, 4  ;;  %v452_v33 = vperm.slane %v443_v27, 1 }
  0xe1   : > { %v283_v49 = vmul.f32 %v281_v40, %v276_v45  ;;  %v423_v15 = vperm.slane %v414_v6, 1  ;;  %v422_v25 = vperm.slane %v414_v6, 0  ;;  %v510_v61 = vperm.slane %v501_v54, 1  ;;  %s1301_s30 = scalar_lea.hbm %s1300_s27, 200 }
  0xe2   : > { %v293_v23 = vpop.permute.xlu1 %292  ;;  %v453_v43 = vrot.slane %v452_v33, 4  ;;  %p1302_p1 = scmp.ne.s32.totalorder %s1300_s27, %s1301_s30 }
  0xe3   : > { %v295_v32 = vsel %vm294_vm8, %v291_v9, %v293_v23  ;;  %v296_v36 = vsel %vm294_vm8, %v293_v23, %v291_v9  ;;  %284 = vst [vmem:[%s1562_s29] sm:$0xff] %v283_v49  ;;  %v409_v24 = vpop.permute.xlu2 %408  ;;  %v424_v26 = vrot.slane %v423_v15, 4  ;;  %vm741_vm8 = vcmp.lt.s32.totalorder %v1546_v19, 112 }
  0xe4   : > { %v301_v42 = vrot.slane %v295_v32, 4  ;;  %v472_v32 = vld [vmem:[#allocation5 + $0xe] sm:$0x3]  ;;  %p1303_p3 = pnand %p1302_p1, %p1488_p4 }
  0xe5   : > { %v481_v38 = vperm.slane %v472_v32, 1 }
  0xe6   : > { %v302_v47 = vsel %vm212_vm0, %v296_v36, %v301_v42  ;;  %v451_v42 = vperm.slane %v443_v27, 0  ;;  %p1304_p9 = pneg %p1303_p3 }
  0xe7   : > { %v762_v11 = vld.sshfl [vmem:[#allocation1] sm:$0xff pattern:$0x75316420]  ;;  %v763_v12 = vld.sshfl [vmem:[#allocation1 + $0x8] sm:$0xff pattern:$0x75316420]  ;;  %v304_v50 = vmul.f32 %v302_v47, %v1525_v37 }
  0xe8   : > { %766 = vrot.lane.b32.xlu1 %v762_v11, %s1393_s16  ;;  %790 = vst [vmem:[#allocation1] ss:$2 sm:$0xff] %v1525_v37  ;;  %768 = vrot.lane.b32.xlu2 %v763_v12, %s1393_s16  ;;  %v395_v11 = vrot.slane %v394_v4, 4  ;;  %v367_v12 = vsel %vm212_vm0, %v364_v60, %v366_v7  ;;  %v482_v51 = vrot.slane %v481_v38, 4  ;;  %v509_v4 = vperm.slane %v501_v54, 0 }
  0xe9   : > { %v311_v53 = vmul.f32 %v309_v46, %v304_v50  ;;  %v480_v50 = vperm.slane %v472_v32, 0 }
  0xea   : > { %v349_v44 = vpop.permute.xlu0 %348  ;;  %v351_v58 = vpop.permute.xlu1 %350  ;;  %v396_v16 = vsel %vm212_vm0, %v393_v3, %v395_v11 }
  0xeb   : > { %1090 = vst [vmem:[%s1562_s29 + $0x8] sm:$0xff] %v311_v53  ;;  %v353_v62 = vsel %vm352_vm10, %v349_v44, %v351_v58  ;;  %v354_v63 = vsel %vm352_vm10, %v351_v58, %v349_v44  ;;  %vm799_vm10 = vcmp.lt.s32.totalorder %v1546_v19, 110 }
  0xec   : > { %v359_v2 = vrot.slane %v353_v62, 4 }
  0xee   : > { %v360_v10 = vsel %vm212_vm0, %v354_v63, %v359_v2 }
  0xef   : > { %v791_v34 = vld.sshfl [vmem:[#allocation1] sm:$0xff pattern:$0x75316420]  ;;  %v792_v35 = vld.sshfl [vmem:[#allocation1 + $0x8] sm:$0xff pattern:$0x75316420]  ;;  %v362_v13 = vmul.f32 %v360_v10, %v1525_v37 }
  0xf0   : > { %795 = vrot.lane.b32.xlu0 %v791_v34, %s1394_s28  ;;  %797 = vrot.lane.b32.xlu1 %v792_v35, %s1394_s28  ;;  %819 = vst [vmem:[#allocation1] ss:$2 sm:$0xff] %v1525_v37  ;;  %v425_v34 = vsel %vm212_vm0, %v422_v25, %v424_v26  ;;  %v559_v25 = vld [vmem:[#allocation5 + $0x14] sm:$0x3]  ;;  %s1305_s28 = scalar_lea.hbm %s1725_s2, 400 }
  0xf1   : > { %v369_v21 = vmul.f32 %v367_v12, %v362_v13  ;;  %p1307_p11 = scmp.lt.s32.totalorder %s1305_s28, %s1301_s30 }
  0xf2   : > { %v380_v59 = vpop.permute.xlu0 %379  ;;  %v465_v47 = vpop.permute.xlu2 %464 }
  0xf3   : > { %v382_v5 = vsel %vm381_vm11, %v378_v1, %v380_v59  ;;  %v383_v8 = vsel %vm381_vm11, %v380_v59, %v378_v1  ;;  %1092 = vst [vmem:[%s1562_s29 + $0x18] sm:$0xff] %v369_v21  ;;  %v483_v59 = vsel %vm212_vm0, %v480_v50, %v482_v51  ;;  %vm828_vm11 = vcmp.lt.s32.totalorder %v1546_v19, 98  ;;  %p1308_p12 = por %p1307_p11, %p1306_p10 }
  0xf4   : > { %v388_v9 = vrot.slane %v382_v5, 4  ;;  %v511_v5 = vrot.slane %v510_v61, 4 }
  0xf5   : > { %p1309_p13 = pnand %p1308_p12, %p1304_p9 }
  0xf6   : > { %v389_v14 = vsel %vm212_vm0, %v383_v8, %v388_v9  ;;  %v530_v9 = vld [vmem:[#allocation5 + $0x12] sm:$0x3]  ;;  %v512_v11 = vsel %vm212_vm0, %v509_v4, %v511_v5 }
  0xf7   : > { %v821_v55 = vld.sshfl [vmem:[#allocation1 + $0x8] sm:$0xff pattern:$0x75316420]  ;;  %v820_v56 = vld.sshfl [vmem:[#allocation1] sm:$0xff pattern:$0x75316420]  ;;  %v391_v17 = vmul.f32 %v389_v14, %v1525_v37 }
  0xf8   : > { %826 = vrot.lane.b32.xlu0 %v821_v55, %s1395_s6  ;;  %848 = vst [vmem:[#allocation1] ss:$2 sm:$0xff] %v1525_v37  ;;  %824 = vrot.lane.b32.xlu2 %v820_v56, %s1395_s6  ;;  %v454_v55 = vsel %vm212_vm0, %v451_v42, %v453_v43  ;;  %v539_v13 = vperm.slane %v530_v9, 1 }
  0xf9   : > { %v398_v22 = vmul.f32 %v396_v16, %v391_v17 }
  0xfa   : > { %v407_v23 = vpop.permute.xlu1 %406  ;;  %v496_v3 = vpop.permute.xlu2 %495  ;;  %v540_v21 = vrot.slane %v539_v13, 4 }
  0xfb   : > { %1093 = vst [vmem:[%s1562_s29 + $0x20] sm:$0xff] %v398_v22  ;;  %v411_v28 = vsel %vm410_vm12, %v407_v23, %v409_v24  ;;  %v412_v29 = vsel %vm410_vm12, %v409_v24, %v407_v23  ;;  %vm857_vm12 = vcmp.lt.s32.totalorder %v1546_v19, 97 }
  0xfc   : > { %v417_v31 = vrot.slane %v411_v28, 4 }
  0xfe   : > { %v418_v35 = vsel %vm212_vm0, %v412_v29, %v417_v31  ;;  %v568_v29 = vperm.slane %v559_v25, 1 }
  0xff   : > { %v849_v18 = vld.sshfl [vmem:[#allocation1] sm:$0xff pattern:$0x75316420]  ;;  %v850_v20 = vld.sshfl [vmem:[#allocation1 + $0x8] sm:$0xff pattern:$0x75316420]  ;;  %v420_v36 = vmul.f32 %v418_v35, %v1525_v37 }
 0x100   : > { %853 = vrot.lane.b32.xlu1 %v849_v18, %s1396_s7  ;;  %877 = vst [vmem:[#allocation1] ss:$2 sm:$0xff] %v1525_v37  ;;  %855 = vrot.lane.b32.xlu2 %v850_v20, %s1396_s7  ;;  %v538_v20 = vperm.slane %v530_v9, 0  ;;  %v569_v35 = vrot.slane %v568_v29, 4 }
 0x101   : > { %v427_v41 = vmul.f32 %v425_v34, %v420_v36  ;;  %v567_v34 = vperm.slane %v559_v25, 0 }
 0x102   : > { %v436_v30 = vpop.permute.xlu0 %435  ;;  %v438_v44 = vpop.permute.xlu1 %437  ;;  %v541_v27 = vsel %vm212_vm0, %v538_v20, %v540_v21 }
 0x103   : > { %v440_v45 = vsel %vm439_vm13, %v436_v30, %v438_v44  ;;  %v441_v46 = vsel %vm439_vm13, %v438_v44, %v436_v30  ;;  %1094 = vst [vmem:[%s1562_s29 + $0x28] sm:$0xff] %v427_v41  ;;  %v570_v41 = vsel %vm212_vm0, %v567_v34, %v569_v35  ;;  %vm886_vm13 = vcmp.lt.s32.totalorder %v1546_v19, 96 }
 0x104   : > { %v446_v48 = vrot.slane %v440_v45, 4 }
 0x106   : > { %v447_v56 = vsel %vm212_vm0, %v441_v46, %v446_v48 }
 0x107   : > { %v878_v39 = vld.sshfl [vmem:[#allocation1] sm:$0xff pattern:$0x75316420]  ;;  %v879_v40 = vld.sshfl [vmem:[#allocation1 + $0x8] sm:$0xff pattern:$0x75316420]  ;;  %v449_v58 = vmul.f32 %v447_v56, %v1525_v37 }
 0x108   : > { %882 = vrot.lane.b32.xlu0 %v878_v39, %s1397_s8  ;;  %884 = vrot.lane.b32.xlu1 %v879_v40, %s1397_s8  ;;  %906 = vst [vmem:[#allocation1] ss:$2 sm:$0xff] %v1525_v37  ;;  %v588_v39 = vld [vmem:[#allocation5 + $0x16] sm:$0x3] }
 0x109   : > { %v456_v0 = vmul.f32 %v454_v55, %v449_v58  ;;  %v597_v43 = vperm.slane %v588_v39, 1 }
 0x10a   : > { %v467_v49 = vpop.permute.xlu0 %466  ;;  %v552_v30 = vpop.permute.xlu2 %551 }
 0x10b   : > { %v469_v52 = vsel %vm468_vm14, %v465_v47, %v467_v49  ;;  %v470_v53 = vsel %vm468_vm14, %v467_v49, %v465_v47  ;;  %1095 = vst [vmem:[%s1562_s29 + $0x30] sm:$0xff] %v456_v0  ;;  %v596_v47 = vperm.slane %v588_v39, 0  ;;  %v598_v48 = vrot.slane %v597_v43, 4 }
 0x10c   : > { %v475_v57 = vrot.slane %v469_v52, 4  ;;  %v629_v52 = vld [vmem:[#allocation5 + $0x1a] sm:$0x3]  ;;  %vm915_vm14 = vcmp.lt.s32.totalorder %v1546_v19, 95 }
 0x10d   : > { %v599_v54 = vsel %vm212_vm0, %v596_v47, %v598_v48  ;;  %v638_v56 = vperm.slane %v629_v52, 1 }
 0x10e   : > { %v476_v60 = vsel %vm212_vm0, %v470_v53, %v475_v57 }
 0x10f   : > { %v908_v62 = vld.sshfl [vmem:[#allocation1 + $0x8] sm:$0xff pattern:$0x75316420]  ;;  %v907_v63 = vld.sshfl [vmem:[#allocation1] sm:$0xff pattern:$0x75316420]  ;;  %v478_v1 = vmul.f32 %v476_v60, %v1525_v37 }
 0x110   : > { %913 = vrot.lane.b32.xlu0 %v908_v62, %s1398_s17  ;;  %935 = vst [vmem:[#allocation1] ss:$2 sm:$0xff] %v1525_v37  ;;  %911 = vrot.lane.b32.xlu2 %v907_v63, %s1398_s17  ;;  %v637_v60 = vperm.slane %v629_v52, 0  ;;  %v639_v61 = vrot.slane %v638_v56, 4 }
 0x111   : > { %v485_v2 = vmul.f32 %v483_v59, %v478_v1  ;;  %v658_v1 = vld [vmem:[#allocation5 + $0x1c] sm:$0x3] }
 0x112   : > { %v494_v6 = vpop.permute.xlu1 %493  ;;  %v583_v45 = vpop.permute.xlu2 %582  ;;  %v667_v5 = vperm.slane %v658_v1, 1 }
 0x113   : > { %1096 = vst [vmem:[%s1562_s29 + $0x38] sm:$0xff] %v485_v2  ;;  %v498_v7 = vsel %vm497_vm15, %v494_v6, %v496_v3  ;;  %v499_v8 = vsel %vm497_vm15, %v496_v3, %v494_v6  ;;  %v640_v3 = vsel %vm212_vm0, %v637_v60, %v639_v61  ;;  %vm944_vm15 = vcmp.lt.s32.totalorder %v1546_v19, 94 }
 0x114   : > { %v504_v10 = vrot.slane %v498_v7, 4 }
 0x116   : > { %v505_v12 = vsel %vm212_vm0, %v499_v8, %v504_v10  ;;  %v666_v10 = vperm.slane %v658_v1, 0 }
 0x117   : > { %v936_v14 = vld.sshfl [vmem:[#allocation1] sm:$0xff pattern:$0x75316420]  ;;  %v937_v15 = vld.sshfl [vmem:[#allocation1 + $0x8] sm:$0xff pattern:$0x75316420]  ;;  %v507_v16 = vmul.f32 %v505_v12, %v1525_v37 }
 0x118   : > { %940 = vrot.lane.b32.xlu1 %v936_v14, %s1399_s18  ;;  %942 = vrot.lane.b32.xlu2 %v937_v15, %s1399_s18  ;;  %v687_v14 = vld [vmem:[#allocation5 + $0x1e] sm:$0x3] }
 0x119   : > { %v514_v17 = vmul.f32 %v512_v11, %v507_v16  ;;  %v668_v11 = vrot.slane %v667_v5, 4 }
 0x11a   : > { %v523_v18 = vpop.permute.xlu0 %522  ;;  %v525_v22 = vpop.permute.xlu1 %524 }
 0x11b   : > { %1097 = vst [vmem:[%s1562_s29 + $0x40] sm:$0xff] %v514_v17  ;;  %v527_v23 = vsel %vm526_vm1, %v523_v18, %v525_v22  ;;  %v528_v24 = vsel %vm526_vm1, %v525_v22, %v523_v18  ;;  %v669_v16 = vsel %vm212_vm0, %v666_v10, %v668_v11  ;;  %v696_v18 = vperm.slane %v687_v14, 1 }
 0x11c   : > { %v533_v26 = vrot.slane %v527_v23, 4  ;;  %v695_v23 = vperm.slane %v687_v14, 0 }
 0x11e   : > { %v534_v28 = vsel %vm212_vm0, %v528_v24, %v533_v26  ;;  %v697_v24 = vrot.slane %v696_v18, 4 }
 0x11f   : > { %v536_v31 = vmul.f32 %v534_v28, %v1525_v37  ;;  %v716_v28 = vld [vmem:[#allocation5 + $0x20] sm:$0x3] }
 0x121   : > { %v543_v32 = vmul.f32 %v541_v27, %v536_v31 }
 0x122   : > { %v554_v33 = vpop.permute.xlu0 %553  ;;  %v651_v6 = vpop.permute.xlu2 %650 }
 0x123   : > { %1098 = vst [vmem:[%s1562_s29 + $0x48] sm:$0xff] %v543_v32  ;;  %v556_v36 = vsel %vm555_vm2, %v552_v30, %v554_v33  ;;  %v557_v38 = vsel %vm555_vm2, %v554_v33, %v552_v30  ;;  %v698_v30 = vsel %vm212_vm0, %v695_v23, %v697_v24  ;;  %v725_v32 = vperm.slane %v716_v28, 1 }
 0x124   : > { %v562_v40 = vrot.slane %v556_v36, 4  ;;  %v724_v36 = vperm.slane %v716_v28, 0 }
 0x126   : > { %v563_v42 = vsel %vm212_vm0, %v557_v38, %v562_v40  ;;  %v726_v38 = vrot.slane %v725_v32, 4  ;;  %v605_v32 = vld [vmem:[#allocation5 + $0x18] sm:$0x3] }
 0x127   : > { %v565_v44 = vmul.f32 %v563_v42, %v1525_v37  ;;  %v745_v42 = vld [vmem:[#allocation5 + $0x22] sm:$0x3] }
 0x129   : > { %v572_v46 = vmul.f32 %v570_v41, %v565_v44  ;;  %v727_v44 = vsel %vm212_vm0, %v724_v36, %v726_v38 }
 0x12a   : > { %v581_v49 = vpop.permute.xlu1 %580  ;;  %v682_v21 = vpop.permute.xlu2 %681 }
 0x12b   : > { %1099 = vst [vmem:[%s1562_s29 + $0x50] sm:$0xff] %v572_v46  ;;  %v585_v50 = vsel %vm584_vm3, %v581_v49, %v583_v45  ;;  %v586_v51 = vsel %vm584_vm3, %v583_v45, %v581_v49  ;;  %v754_v46 = vperm.slane %v745_v42, 1 }
 0x12c   : > { %v591_v53 = vrot.slane %v585_v50, 4 }
 0x12d   : > { %v755_v52 = vrot.slane %v754_v46, 4 }
 0x12e   : > { %v592_v55 = vsel %vm212_vm0, %v586_v51, %v591_v53  ;;  %v753_v51 = vperm.slane %v745_v42, 0  ;;  %v606_v42 = vmul.f32 %v1525_v37, %v1525_v37 }
 0x12f   : > { %v594_v57 = vmul.f32 %v592_v55, %v1525_v37  ;;  %v774_v55 = vld [vmem:[#allocation5 + $0x24] sm:$0x3] }
 0x131   : > { %v601_v58 = vmul.f32 %v599_v54, %v594_v57  ;;  %v756_v57 = vsel %vm212_vm0, %v753_v51, %v755_v52  ;;  %v890_v52 = vld [vmem:[#allocation5 + $0x2c] sm:$0x3] }
 0x132   : > { %v622_v59 = vpop.permute.xlu0 %621  ;;  %v624_v62 = vpop.permute.xlu1 %623 }
 0x133   : > { %1100 = vst [vmem:[%s1562_s29 + $0x58] sm:$0xff] %v601_v58  ;;  %v626_v63 = vsel %vm625_vm4, %v622_v59, %v624_v62  ;;  %v627_v0 = vsel %vm625_vm4, %v624_v62, %v622_v59  ;;  %v783_v59 = vperm.slane %v774_v55, 1 }
 0x134   : > { %v632_v2 = vrot.slane %v627_v0, 4 }
 0x135   : > { %v784_v0 = vrot.slane %v783_v59, 4 }
 0x136   : > { %v633_v4 = vsel %vm212_vm0, %v626_v63, %v632_v2  ;;  %v782_v63 = vperm.slane %v774_v55, 0 }
 0x137   : > { %v635_v7 = vmul.f32 %v633_v4, %v1525_v37  ;;  %v803_v4 = vld [vmem:[#allocation5 + $0x26] sm:$0x3] }
 0x139   : > { %v642_v8 = vmul.f32 %v640_v3, %v635_v7 }
 0x13a   : > { %v653_v9 = vpop.permute.xlu0 %652  ;;  %v738_v47 = vpop.permute.xlu2 %737 }
 0x13b   : > { %1102 = vst [vmem:[%s1562_s29 + $0x68] sm:$0xff] %v642_v8  ;;  %v655_v12 = vsel %vm654_vm5, %v651_v6, %v653_v9  ;;  %v656_v13 = vsel %vm654_vm5, %v653_v9, %v651_v6  ;;  %v785_v6 = vsel %vm212_vm0, %v782_v63, %v784_v0  ;;  %v812_v8 = vperm.slane %v803_v4, 1 }
 0x13c   : > { %v661_v15 = vrot.slane %v656_v13, 4 }
 0x13d   : > { %v813_v13 = vrot.slane %v812_v8, 4 }
 0x13e   : > { %v662_v17 = vsel %vm212_vm0, %v655_v12, %v661_v15  ;;  %v811_v12 = vperm.slane %v803_v4, 0  ;;  %v832_v15 = vld [vmem:[#allocation5 + $0x28] sm:$0x3] }
 0x13f   : > { %v664_v20 = vmul.f32 %v662_v17, %v1525_v37 }
 0x141   : > { %v671_v22 = vmul.f32 %v669_v16, %v664_v20  ;;  %v841_v20 = vperm.slane %v832_v15, 1 }
 0x142   : > { %v680_v25 = vpop.permute.xlu1 %679  ;;  %v769_v61 = vpop.permute.xlu2 %768 }
 0x143   : > { %1103 = vst [vmem:[%s1562_s29 + $0x70] sm:$0xff] %v671_v22  ;;  %v684_v26 = vsel %vm683_vm6, %v680_v25, %v682_v21  ;;  %v685_v27 = vsel %vm683_vm6, %v682_v21, %v680_v25  ;;  %v814_v21 = vsel %vm212_vm0, %v811_v12, %v813_v13  ;;  %v948_v13 = vld [vmem:[#allocation5 + $0x30] sm:$0x3] }
 0x144   : > { %v690_v29 = vrot.slane %v685_v27, 4  ;;  %v842_v27 = vrot.slane %v841_v20, 4 }
 0x146   : > { %v691_v31 = vsel %vm212_vm0, %v684_v26, %v690_v29  ;;  %v840_v26 = vperm.slane %v832_v15, 0 }
 0x147   : > { %v693_v33 = vmul.f32 %v691_v31, %v1525_v37  ;;  %v861_v31 = vld [vmem:[#allocation5 + $0x2a] sm:$0x3] }
 0x148   : > { %v870_v38 = vperm.slane %v861_v31, 1 }
 0x149   : > { %v700_v34 = vmul.f32 %v698_v30, %v693_v33 }
 0x14a   : > { %v709_v35 = vpop.permute.xlu0 %708  ;;  %v711_v39 = vpop.permute.xlu1 %710 }
 0x14b   : > { %1104 = vst [vmem:[%s1562_s29 + $0x78] sm:$0xff] %v700_v34  ;;  %v713_v40 = vsel %vm712_vm7, %v709_v35, %v711_v39  ;;  %v714_v41 = vsel %vm712_vm7, %v711_v39, %v709_v35  ;;  %v609_v34 = vperm.slane %v605_v32, 1  ;;  %v843_v35 = vsel %vm212_vm0, %v840_v26, %v842_v27 }
 0x14c   : > { %v719_v43 = vrot.slane %v714_v41, 4  ;;  %v608_v39 = vperm.slane %v605_v32, 0 }
 0x14e   : > { %v720_v45 = vsel %vm212_vm0, %v713_v40, %v719_v43  ;;  %v610_v40 = vrot.slane %v609_v34, 4 }
 0x14f   : > { %v722_v48 = vmul.f32 %v720_v45, %v1525_v37 }
 0x151   : > { %v729_v49 = vmul.f32 %v727_v44, %v722_v48  ;;  %v611_v44 = vsel %vm212_vm0, %v608_v39, %v610_v40  ;;  %v871_v48 = vrot.slane %v870_v38, 4 }
 0x152   : > { %v740_v50 = vpop.permute.xlu0 %739  ;;  %v825_v23 = vpop.permute.xlu2 %824  ;;  %v613_v46 = vmul.f32 %v611_v44, %v606_v42 }
 0x153   : > { %1105 = vst [vmem:[%s1562_s29 + $0x80] sm:$0xff] %v729_v49  ;;  %v742_v53 = vsel %vm741_vm8, %v738_v47, %v740_v50  ;;  %v743_v54 = vsel %vm741_vm8, %v740_v50, %v738_v47  ;;  %v869_v47 = vperm.slane %v861_v31, 0 }
 0x154   : > { %v748_v56 = vrot.slane %v743_v54, 4  ;;  %1101 = vst [vmem:[%s1562_s29 + $0x60] sm:$0xff] %v613_v46 }
 0x155   : > { %v872_v54 = vsel %vm212_vm0, %v869_v47, %v871_v48 }
 0x156   : > { %v749_v58 = vsel %vm212_vm0, %v742_v53, %v748_v56  ;;  %v899_v56 = vperm.slane %v890_v52, 1 }
 0x157   : > { %v751_v60 = vmul.f32 %v749_v58, %v1525_v37 }
 0x159   : > { %v758_v62 = vmul.f32 %v756_v57, %v751_v60  ;;  %v898_v60 = vperm.slane %v890_v52, 0 }
 0x15a   : > { %v767_v1 = vpop.permute.xlu1 %766  ;;  %v856_v43 = vpop.permute.xlu2 %855 }
 0x15b   : > { %1106 = vst [vmem:[%s1562_s29 + $0x88] sm:$0xff] %v758_v62  ;;  %v771_v2 = vsel %vm770_vm9, %v767_v1, %v769_v61  ;;  %v772_v3 = vsel %vm770_vm9, %v769_v61, %v767_v1  ;;  %v900_v61 = vrot.slane %v899_v56, 4  ;;  %v919_v1 = vld [vmem:[#allocation5 + $0x2e] sm:$0x3] }
 0x15c   : > { %v777_v5 = vrot.slane %v772_v3, 4 }
 0x15d   : > { %v901_v3 = vsel %vm212_vm0, %v898_v60, %v900_v61 }
 0x15e   : > { %v778_v7 = vsel %vm212_vm0, %v771_v2, %v777_v5  ;;  %v928_v5 = vperm.slane %v919_v1, 1 }
 0x15f   : > { %v780_v9 = vmul.f32 %v778_v7, %v1525_v37 }
 0x161   : > { %v787_v10 = vmul.f32 %v785_v6, %v780_v9 }
 0x162   : > { %v796_v11 = vpop.permute.xlu0 %795  ;;  %v798_v14 = vpop.permute.xlu1 %797 }
 0x163   : > { %1107 = vst [vmem:[%s1562_s29 + $0x90] sm:$0xff] %v787_v10  ;;  %v800_v16 = vsel %vm799_vm10, %v796_v11, %v798_v14  ;;  %v801_v17 = vsel %vm799_vm10, %v798_v14, %v796_v11  ;;  %v927_v10 = vperm.slane %v919_v1, 0  ;;  %v929_v11 = vrot.slane %v928_v5, 4 }
 0x164   : > { %v806_v18 = vrot.slane %v801_v17, 4 }
 0x166   : > { %v807_v22 = vsel %vm212_vm0, %v800_v16, %v806_v18  ;;  %v930_v16 = vsel %vm212_vm0, %v927_v10, %v929_v11  ;;  %v957_v18 = vperm.slane %v948_v13, 1 }
 0x167   : > { %v809_v24 = vmul.f32 %v807_v22, %v1525_v37 }
 0x169   : > { %v816_v25 = vmul.f32 %v814_v21, %v809_v24  ;;  %v958_v24 = vrot.slane %v957_v18, 4 }
 0x16a   : > { %v827_v28 = vpop.permute.xlu0 %826  ;;  %v912_v6 = vpop.permute.xlu2 %911 }
 0x16b   : > { %1108 = vst [vmem:[%s1562_s29 + $0x98] sm:$0xff] %v816_v25  ;;  %v829_v29 = vsel %vm828_vm11, %v825_v23, %v827_v28  ;;  %v830_v30 = vsel %vm828_vm11, %v827_v28, %v825_v23  ;;  %v956_v23 = vperm.slane %v948_v13, 0 }
 0x16c   : > { %v835_v33 = vrot.slane %v830_v30, 4 }
 0x16e   : > { %v836_v36 = vsel %vm212_vm0, %v829_v29, %v835_v33  ;;  %v959_v29 = vsel %vm212_vm0, %v956_v23, %v958_v24 }
 0x16f   : > { %v838_v41 = vmul.f32 %v836_v36, %v1525_v37 }
 0x171   : > { %v845_v45 = vmul.f32 %v843_v35, %v838_v41 }
 0x172   : > { %v854_v49 = vpop.permute.xlu1 %853  ;;  %v943_v21 = vpop.permute.xlu2 %942 }
 0x173   : > { %1109 = vst [vmem:[%s1562_s29 + $0xa0] sm:$0xff] %v845_v45  ;;  %v858_v50 = vsel %vm857_vm12, %v854_v49, %v856_v43  ;;  %v859_v51 = vsel %vm857_vm12, %v856_v43, %v854_v49 }
 0x174   : > { %v864_v53 = vrot.slane %v859_v51, 4 }
 0x176   : > { %v865_v55 = vsel %vm212_vm0, %v858_v50, %v864_v53 }
 0x177   : > { %v867_v57 = vmul.f32 %v865_v55, %v1525_v37 }
 0x179   : > { %v874_v58 = vmul.f32 %v872_v54, %v867_v57 }
 0x17a   : > { %v883_v59 = vpop.permute.xlu0 %882  ;;  %v885_v62 = vpop.permute.xlu1 %884 }
 0x17b   : > { %1110 = vst [vmem:[%s1562_s29 + $0xa8] sm:$0xff] %v874_v58  ;;  %v887_v63 = vsel %vm886_vm13, %v883_v59, %v885_v62  ;;  %v888_v0 = vsel %vm886_vm13, %v885_v62, %v883_v59 }
 0x17c   : > { %v893_v2 = vrot.slane %v888_v0, 4 }
 0x17e   : > { %v894_v4 = vsel %vm212_vm0, %v887_v63, %v893_v2 }
 0x17f   : > { %v896_v7 = vmul.f32 %v894_v4, %v1525_v37 }
 0x181   : > { %v903_v8 = vmul.f32 %v901_v3, %v896_v7 }
 0x182   : > { %v914_v9 = vpop.permute.xlu0 %913 }
 0x183   : > { %1111 = vst [vmem:[%s1562_s29 + $0xb0] sm:$0xff] %v903_v8  ;;  %v917_v12 = vsel %vm915_vm14, %v914_v9, %v912_v6  ;;  %v916_v15 = vsel %vm915_vm14, %v912_v6, %v914_v9 }
 0x184   : > { %v922_v14 = vrot.slane %v917_v12, 4 }
 0x186   : > { %v923_v17 = vsel %vm212_vm0, %v916_v15, %v922_v14 }
 0x187   : > { %v925_v20 = vmul.f32 %v923_v17, %v1525_v37 }
 0x189   : > { %v932_v22 = vmul.f32 %v930_v16, %v925_v20 }
 0x18a   : > { %v941_v25 = vpop.permute.xlu1 %940 }
 0x18b   : > { %1112 = vst [vmem:[%s1562_s29 + $0xb8] sm:$0xff] %v932_v22  ;;  %v946_v26 = vsel %vm944_vm15, %v943_v21, %v941_v25  ;;  %v945_v28 = vsel %vm944_vm15, %v941_v25, %v943_v21 }
 0x18c   : > { %v951_v27 = vrot.slane %v946_v26, 4 }
 0x18e   : > { %v952_v19 = vsel %vm212_vm0, %v945_v28, %v951_v27 }
 0x18f   : > { %v954_v30 = vmul.f32 %v952_v19, %v1525_v37 }
 0x191   : > { %v961_v31 = vmul.f32 %v959_v29, %v954_v30 }
 0x193   : > { %1113 = vst [vmem:[%s1562_s29 + $0xc0] sm:$0xff] %v961_v31 }
 0x194   : > { %1312 = shalt.err (!%p1309_p13)
}
 0x195   : > { %s1400_s24 = smov 128   ;;  %s1401_s29 = smov 8  }
 0x196   : > { %1126 = dma.vmem_to_hbm [thread:$0]  (%p1488_p4), %s981_s23, 3200, %s983_s12, %s965_s25, %s1400_s24, %s1400_s24, %s1401_s29  }
 0x197 PF: > { %s997_s8 = sand.u32 1, %s1351_s9   ;;  %p1137_p0 = pnand %p1083_p6, %p1496_p7 }
 0x198   : > { %s998_s17 = scalar_lea.sflag [#allocation4], %s997_s8 }
 0x199   : > { %p1138_p2 = pneg %p1137_p0 }
 0x19b   : > { %1346 = dma.done.wait (%p1138_p2), %s998_s17, 3200  }
 0x19c   : > { %1348 = vsyncadd (%p1138_p2), %s998_s17, 4294964096  ;;  %s19_s14 = sadd.s32 1, %s1371_s14   ;;  %s1732_s9 = smov %s1355_s10 }
 0x19d   : > { %p16_p5 = scmp.ge.s32.totalorder %s19_s14, 4   ;;  %s1733_s10 = smov %s1359_s11 }
 0x19e   : > { %s1734_s11 = smov %s1494_s4  ;;  %s1735_s12 = smov %s1367_s13 }
 0x19f   : > { %s1736_s13 = smov %s1738_s26  ;;  %18 = sbr.rel (!%p16_p5) target bundleno = 7 (0x7), region = 126 }
 0x1a4   :  { %1004 = vsyncpa [#allocation3], 1 }
 0x1a5   :  { %1006 = vsyncpa [#allocation3 + $0x1], 1 }
 0x1a6   :  { %1007 = vsyncpa [#allocation6], 1 }
 0x1a7   :  { %1008 = vsyncpa [#allocation4], 1 }
 0x1a8   :  { %1010 = vsyncpa [#allocation4 + $0x1], 1 }

</bundles_post_ra>
